<compile_context>
chip_gen: v6e
topology: v6e:2x2x1
jax: 0.10.0
libtpu: 0.0.40
codegen_flags: <defaults>
</compile_context>

<pallas_src>
import functools

import jax
import jax.numpy as jnp
from jax import lax
from jax.experimental import pallas as pl
from jax.experimental.pallas import tpu as pltpu

_LANES = 128


def _round_up(x, m):
    return ((x + m - 1) // m) * m


def _chamfer_kernel(a1_ref, a2_ref, out1_ref, out2_ref, rowmin_ref, colmin_ref,
                    *, n1, n2):
    # grid = (B, n2_tiles, n1_tiles); i1 (array1 tiles) is innermost.
    i2 = pl.program_id(1)
    i1 = pl.program_id(2)
    n2t = pl.num_programs(1)
    n1t = pl.num_programs(2)

    a1 = a1_ref[0]                                   # (tn1, F)
    a2 = a2_ref[0]                                   # (tn2, F)
    tn1 = a1.shape[0]
    tn2 = a2.shape[0]
    a1f = a1.astype(jnp.float32)
    a2f = a2.astype(jnp.float32)

    # Pairwise squared distances via the MXU:  d = |a2|^2 + |a1|^2 - 2 a2.a1^T
    cross = lax.dot_general(
        a2, a1,
        dimension_numbers=(((1,), (1,)), ((), ())),
        preferred_element_type=jnp.float32,
        precision=lax.Precision.HIGHEST)             # (tn2, tn1)
    sq1 = jnp.sum(a1f * a1f, axis=-1)                # (tn1,)
    sq2 = jnp.sum(a2f * a2f, axis=-1, keepdims=True)  # (tn2, 1)
    d = jnp.maximum(sq2 + sq1[None, :] - 2.0 * cross, 0.0)   # (tn2, tn1)

    # Validity masks for padded rows / columns (n1, n2 are the true sizes).
    col_ids = lax.broadcasted_iota(jnp.int32, (1, tn1), 1) + i1 * tn1
    row_ids = lax.broadcasted_iota(jnp.int32, (tn2, 1), 0) + i2 * tn2
    valid_col = col_ids < n1
    valid_row = row_ids < n2
    inf = jnp.float32(jnp.inf)

    # ---- running min over array1 points (axis 1): per-array2-sample distance
    d_row = jnp.where(valid_col, d, inf)
    rowmin_tile = jnp.min(d_row, axis=1, keepdims=True)       # (tn2, 1)

    @pl.when(i1 == 0)
    def _():
        rowmin_ref[...] = rowmin_tile

    @pl.when(i1 > 0)
    def _():
        rowmin_ref[...] = jnp.minimum(rowmin_ref[...], rowmin_tile)

    # ---- running min over array2 points (axis 0): per-array1-sample distance
    d_col = jnp.where(valid_row, d, inf)
    colmin_tile = jnp.min(d_col, axis=0, keepdims=True)        # (1, tn1)

    @pl.when(i2 == 0)
    def _():
        colmin_ref[i1] = jnp.where(valid_col, colmin_tile, 0.0)

    @pl.when(i2 > 0)
    def _():
        colmin_ref[i1] = jnp.where(
            valid_col, jnp.minimum(colmin_ref[i1], colmin_tile), 0.0)

    # ---- accumulate av_dist1 = mean_j min_i d[j, i] into the output block ----
    @pl.when(i1 == n1t - 1)
    def _():
        contrib = jnp.sum(jnp.where(valid_row, rowmin_ref[...], 0.0)) * (1.0 / n2)

        @pl.when(i2 == 0)
        def _():
            out1_ref[...] = jnp.full(out1_ref.shape, contrib, jnp.float32)

        @pl.when(i2 > 0)
        def _():
            out1_ref[...] = out1_ref[...] + contrib

    # ---- finalize av_dist2 = mean_i min_j d[j, i] ----------------------------
    @pl.when(jnp.logical_and(i2 == n2t - 1, i1 == n1t - 1))
    def _():
        av2 = jnp.sum(colmin_ref[...]) * (1.0 / n1)
        out2_ref[...] = jnp.full(out2_ref.shape, av2, jnp.float32)


def point_loss_test(array1, array2, *, tile_n=512):
    """Pallas implementation of PointLoss_test.forward.

    array1, array2: (B, N, F) float arrays.
    Returns (dist_all, dist1, dist2) float32 scalars.
    """
    B, N1, F = array1.shape
    B2, N2, F2 = array2.shape
    assert B == B2 and F == F2

    # Tile sizes: 128-multiples (lane-dense distance tiles), capped by tile_n.
    tn1 = min(tile_n, _round_up(N1, _LANES))
    tn2 = min(tile_n, _round_up(N2, _LANES))
    n1p = _round_up(N1, tn1)
    n2p = _round_up(N2, tn2)
    a1 = array1 if n1p == N1 else jnp.pad(array1, ((0, 0), (0, n1p - N1), (0, 0)))
    a2 = array2 if n2p == N2 else jnp.pad(array2, ((0, 0), (0, n2p - N2), (0, 0)))
    n1t = n1p // tn1
    n2t = n2p // tn2

    kernel = functools.partial(_chamfer_kernel, n1=N1, n2=N2)

    out_shape = (
        jax.ShapeDtypeStruct((B, 8, _LANES), jnp.float32),   # per-batch av_dist1
        jax.ShapeDtypeStruct((B, 8, _LANES), jnp.float32),   # per-batch av_dist2
    )

    grid_spec = pltpu.PrefetchScalarGridSpec(
        num_scalar_prefetch=0,
        grid=(B, n2t, n1t),
        in_specs=[
            pl.BlockSpec((1, tn1, F), lambda b, i2, i1: (b, i1, 0)),
            pl.BlockSpec((1, tn2, F), lambda b, i2, i1: (b, i2, 0)),
        ],
        out_specs=[
            pl.BlockSpec((1, 8, _LANES), lambda b, i2, i1: (b, 0, 0)),
            pl.BlockSpec((1, 8, _LANES), lambda b, i2, i1: (b, 0, 0)),
        ],
        scratch_shapes=[
            pltpu.VMEM((tn2, 1), jnp.float32),        # running row-min (per i2 tile)
            pltpu.VMEM((n1t, 1, tn1), jnp.float32),   # running col-min over all N1
        ],
    )

    cost = pl.CostEstimate(
        flops=int(2 * B * N1 * N2 * F),
        transcendentals=0,
        bytes_accessed=int(4 * B * (N1 + N2) * F + 2 * B * 8 * _LANES * 4),
    )

    o1, o2 = pl.pallas_call(
        kernel,
        out_shape=out_shape,
        grid_spec=grid_spec,
        compiler_params=pltpu.CompilerParams(
            dimension_semantics=("parallel", "arbitrary", "arbitrary"),
        ),
        cost_estimate=cost,
    )(a1, a2)

    dist1 = jnp.mean(o1[:, 0, 0])
    dist2 = jnp.mean(o2[:, 0, 0])
    return dist1 + dist2, dist1, dist2


def _reference(array1, array2):
    """Pure-JAX reference matching the PyTorch code (exact diff^2 form)."""
    def per_batch(p1, p2):
        diff = p2[:, None, :] - p1[None, :, :]
        d = jnp.sum(diff * diff, axis=-1)
        av1 = jnp.mean(jnp.min(d, axis=1))
        av2 = jnp.mean(jnp.min(d, axis=0))
        return av1, av2

    av1, av2 = jax.vmap(per_batch)(array1, array2)
    d1 = jnp.mean(av1)
    d2 = jnp.mean(av2)
    return d1 + d2, d1, d2


if __name__ == "__main__":
    key = jax.random.PRNGKey(0)
    k1, k2, k3, k4 = jax.random.split(key, 4)

    # Small shapes matching the module's toy usage.
    B, N, F = 2, 16, 3
    array1 = jax.random.normal(k1, (B, N, F), dtype=jnp.float32)
    array2 = jax.random.normal(k2, (B, N, F), dtype=jnp.float32)

    dist_all, dist1, dist2 = point_loss_test(array1, array2)
    jax.block_until_ready((dist_all, dist1, dist2))

    ref_all, ref1, ref2 = _reference(array1, array2)
    assert jnp.allclose(dist_all, ref_all, rtol=1e-4, atol=1e-5)
    assert jnp.allclose(dist1, ref1, rtol=1e-4, atol=1e-5)
    assert jnp.allclose(dist2, ref2, rtol=1e-4, atol=1e-5)

    # Exercise the multi-tile + ragged-padding paths (2x2 tiles per batch).
    Nb = 200
    b1 = jax.random.normal(k3, (B, Nb, F), dtype=jnp.float32)
    b2 = jax.random.normal(k4, (B, Nb, F), dtype=jnp.float32)
    got = point_loss_test(b1, b2, tile_n=128)
    jax.block_until_ready(got)
    want = _reference(b1, b2)
    for g, w in zip(got, want):
        assert jnp.allclose(g, w, rtol=1e-4, atol=1e-5)

    print("KERNEL_OK")
</pallas_src>

<mosaic_0001>
module attributes {stable_mosaic.version = 11 : i64} {
  func.func @_chamfer_kernel(%arg0: i32, %arg1: i32, %arg2: i32, %arg3: memref<1x128x3xf32, #tpu.memory_space<vmem>>, %arg4: memref<1x128x3xf32, #tpu.memory_space<vmem>>, %arg5: memref<1x8x128xf32, #tpu.memory_space<vmem>>, %arg6: memref<1x8x128xf32, #tpu.memory_space<vmem>>, %arg7: memref<128x1xf32, #tpu.memory_space<vmem>>, %arg8: memref<1x1x128xf32, #tpu.memory_space<vmem>>) attributes {dimension_semantics = [#tpu.dimension_semantics<parallel>, #tpu.dimension_semantics<arbitrary>, #tpu.dimension_semantics<arbitrary>], iteration_bounds = array<i64: 2, 1, 1>, scalar_prefetch = 0 : i64, scratch_operands = 2 : i64, tpu.core_type = #tpu.core_type<tc>, window_params = [{transform_indices = @transform_0, window_bounds = array<i64: 1, 128, 3>}, {transform_indices = @transform_1, window_bounds = array<i64: 1, 128, 3>}, {transform_indices = @transform_2, window_bounds = array<i64: 1, 8, 128>}, {transform_indices = @transform_3, window_bounds = array<i64: 1, 8, 128>}]} {
    %c0 = arith.constant 0 : index
    %c0_0 = arith.constant 0 : index
    %c0_1 = arith.constant 0 : index
    %0 = vector.load %arg3[%c0, %c0_0, %c0_1] : memref<1x128x3xf32, #tpu.memory_space<vmem>>, vector<1x128x3xf32>
    %1 = vector.shape_cast %0 : vector<1x128x3xf32> to vector<128x3xf32>
    %c0_2 = arith.constant 0 : index
    %c0_3 = arith.constant 0 : index
    %c0_4 = arith.constant 0 : index
    %2 = vector.load %arg4[%c0_2, %c0_3, %c0_4] : memref<1x128x3xf32, #tpu.memory_space<vmem>>, vector<1x128x3xf32>
    %3 = vector.shape_cast %2 : vector<1x128x3xf32> to vector<128x3xf32>
    %cst = arith.constant dense<0.000000e+00> : vector<128x128xf32>
    %4 = tpu.matmul %3, %1, %cst {dimension_numbers = #tpu.dot_dimension_numbers<[1], [1], [0], [0], [0, 0, 1, 0], [], []>, precision = #tpu.contract_precision<fp32>} : vector<128x3xf32>, vector<128x3xf32>, vector<128x128xf32> -> vector<128x128xf32>
    %5 = arith.mulf %1, %1 : vector<128x3xf32>
    %cst_5 = arith.constant dense<0.000000e+00> : vector<128xf32>
    %6 = vector.multi_reduction <add>, %5, %cst_5 [1] : vector<128x3xf32> to vector<128xf32>
    %7 = arith.mulf %3, %3 : vector<128x3xf32>
    %cst_6 = arith.constant dense<0.000000e+00> : vector<128xf32>
    %8 = vector.multi_reduction <add>, %7, %cst_6 [1] : vector<128x3xf32> to vector<128xf32>
    %9 = vector.shape_cast %8 : vector<128xf32> to vector<128x1xf32>
    %10 = vector.shape_cast %6 : vector<128xf32> to vector<1x128xf32>
    %11 = vector.broadcast %9 : vector<128x1xf32> to vector<128x128xf32>
    %12 = vector.broadcast %10 : vector<1x128xf32> to vector<128x128xf32>
    %13 = arith.addf %11, %12 : vector<128x128xf32>
    %cst_7 = arith.constant 2.000000e+00 : f32
    %14 = vector.broadcast %cst_7 : f32 to vector<128x128xf32>
    %15 = arith.mulf %14, %4 : vector<128x128xf32>
    %16 = arith.subf %13, %15 : vector<128x128xf32>
    %cst_8 = arith.constant 0.000000e+00 : f32
    %17 = vector.broadcast %cst_8 : f32 to vector<128x128xf32>
    %18 = arith.maximumf %16, %17 : vector<128x128xf32>
    %19 = tpu.iota {dimensions = array<i32: 1>} : vector<1x128xi32>
    %c128_i32 = arith.constant 128 : i32
    %20 = arith.muli %arg2, %c128_i32 : i32
    %21 = vector.broadcast %20 : i32 to vector<1x128xi32>
    %22 = arith.addi %19, %21 : vector<1x128xi32>
    %23 = tpu.iota {dimensions = array<i32: 0>} : vector<128x1xi32>
    %c128_i32_9 = arith.constant 128 : i32
    %24 = arith.muli %arg1, %c128_i32_9 : i32
    %25 = vector.broadcast %24 : i32 to vector<128x1xi32>
    %26 = arith.addi %23, %25 : vector<128x1xi32>
    %c16_i32 = arith.constant 16 : i32
    %27 = vector.broadcast %c16_i32 : i32 to vector<1x128xi32>
    %28 = arith.cmpi slt, %22, %27 : vector<1x128xi32>
    %c16_i32_10 = arith.constant 16 : i32
    %29 = vector.broadcast %c16_i32_10 : i32 to vector<128x1xi32>
    %30 = arith.cmpi slt, %26, %29 : vector<128x1xi32>
    %cst_11 = arith.constant 0x7F800000 : f32
    %31 = vector.shape_cast %28 : vector<1x128xi1> to vector<1x128xi1>
    %32 = vector.broadcast %31 : vector<1x128xi1> to vector<128x128xi1>
    %33 = vector.broadcast %cst_11 : f32 to vector<128x128xf32>
    %34 = arith.select %32, %18, %33 : vector<128x128xi1>, vector<128x128xf32>
    %cst_12 = arith.constant dense<0x7F800000> : vector<128xf32>
    %35 = vector.multi_reduction <minimumf>, %34, %cst_12 [1] : vector<128x128xf32> to vector<128xf32>
    %36 = vector.shape_cast %35 : vector<128xf32> to vector<128x1xf32>
    %c0_i32 = arith.constant 0 : i32
    %37 = arith.cmpi eq, %arg2, %c0_i32 : i32
    %38 = arith.extui %37 : i1 to i32
    %c0_i32_13 = arith.constant 0 : i32
    %39 = arith.cmpi ne, %38, %c0_i32_13 : i32
    scf.if %39 {
      %c0_27 = arith.constant 0 : index
      %c0_28 = arith.constant 0 : index
      %63 = vector.load %arg7[%c0_27, %c0_28] : memref<128x1xf32, #tpu.memory_space<vmem>>, vector<128x1xf32>
      tpu.vector_store %arg7[%c0_27, %c0_28], %36 {strides = array<i32>} : memref<128x1xf32, #tpu.memory_space<vmem>>, vector<128x1xf32>,
    } else {
    }
    %c0_i32_14 = arith.constant 0 : i32
    %40 = arith.cmpi sgt, %arg2, %c0_i32_14 : i32
    %41 = arith.extui %40 : i1 to i32
    %c0_i32_15 = arith.constant 0 : i32
    %42 = arith.cmpi ne, %41, %c0_i32_15 : i32
    scf.if %42 {
      %c0_27 = arith.constant 0 : index
      %c0_28 = arith.constant 0 : index
      %63 = vector.load %arg7[%c0_27, %c0_28] : memref<128x1xf32, #tpu.memory_space<vmem>>, vector<128x1xf32>
      %64 = arith.minimumf %63, %36 : vector<128x1xf32>
      %c0_29 = arith.constant 0 : index
      %c0_30 = arith.constant 0 : index
      %65 = vector.load %arg7[%c0_29, %c0_30] : memref<128x1xf32, #tpu.memory_space<vmem>>, vector<128x1xf32>
      tpu.vector_store %arg7[%c0_29, %c0_30], %64 {strides = array<i32>} : memref<128x1xf32, #tpu.memory_space<vmem>>, vector<128x1xf32>,
    } else {
    }
    %cst_16 = arith.constant 0x7F800000 : f32
    %43 = vector.shape_cast %30 : vector<128x1xi1> to vector<128x1xi1>
    %44 = vector.broadcast %43 : vector<128x1xi1> to vector<128x128xi1>
    %45 = vector.broadcast %cst_16 : f32 to vector<128x128xf32>
    %46 = arith.select %44, %18, %45 : vector<128x128xi1>, vector<128x128xf32>
    %cst_17 = arith.constant dense<0x7F800000> : vector<128xf32>
    %47 = vector.multi_reduction <minimumf>, %46, %cst_17 [0] : vector<128x128xf32> to vector<128xf32>
    %48 = vector.shape_cast %47 : vector<128xf32> to vector<1x128xf32>
    %c0_i32_18 = arith.constant 0 : i32
    %49 = arith.cmpi eq, %arg1, %c0_i32_18 : i32
    %50 = arith.extui %49 : i1 to i32
    %c0_i32_19 = arith.constant 0 : i32
    %51 = arith.cmpi ne, %50, %c0_i32_19 : i32
    scf.if %51 {
      %cst_27 = arith.constant 0.000000e+00 : f32
      %63 = vector.broadcast %cst_27 : f32 to vector<1x128xf32>
      %64 = arith.select %28, %48, %63 : vector<1x128xi1>, vector<1x128xf32>
      %65 = arith.index_cast %arg2 : i32 to index
      %c0_28 = arith.constant 0 : index
      %c0_29 = arith.constant 0 : index
      %66 = vector.load %arg8[%65, %c0_28, %c0_29] : memref<1x1x128xf32, #tpu.memory_space<vmem>>, vector<1x1x128xf32>
      %67 = vector.shape_cast %66 : vector<1x1x128xf32> to vector<1x128xf32>
      %68 = vector.shape_cast %64 : vector<1x128xf32> to vector<1x1x128xf32>
      tpu.vector_store %arg8[%65, %c0_28, %c0_29], %68 {strides = array<i32>} : memref<1x1x128xf32, #tpu.memory_space<vmem>>, vector<1x1x128xf32>,
    } else {
    }
    %c0_i32_20 = arith.constant 0 : i32
    %52 = arith.cmpi sgt, %arg1, %c0_i32_20 : i32
    %53 = arith.extui %52 : i1 to i32
    %c0_i32_21 = arith.constant 0 : i32
    %54 = arith.cmpi ne, %53, %c0_i32_21 : i32
    scf.if %54 {
      %63 = arith.index_cast %arg2 : i32 to index
      %c0_27 = arith.constant 0 : index
      %c0_28 = arith.constant 0 : index
      %64 = vector.load %arg8[%63, %c0_27, %c0_28] : memref<1x1x128xf32, #tpu.memory_space<vmem>>, vector<1x1x128xf32>
      %65 = vector.shape_cast %64 : vector<1x1x128xf32> to vector<1x128xf32>
      %66 = arith.minimumf %65, %48 : vector<1x128xf32>
      %cst_29 = arith.constant 0.000000e+00 : f32
      %67 = vector.broadcast %cst_29 : f32 to vector<1x128xf32>
      %68 = arith.select %28, %66, %67 : vector<1x128xi1>, vector<1x128xf32>
      %69 = arith.index_cast %arg2 : i32 to index
      %c0_30 = arith.constant 0 : index
      %c0_31 = arith.constant 0 : index
      %70 = vector.load %arg8[%69, %c0_30, %c0_31] : memref<1x1x128xf32, #tpu.memory_space<vmem>>, vector<1x1x128xf32>
      %71 = vector.shape_cast %70 : vector<1x1x128xf32> to vector<1x128xf32>
      %72 = vector.shape_cast %68 : vector<1x128xf32> to vector<1x1x128xf32>
      tpu.vector_store %arg8[%69, %c0_30, %c0_31], %72 {strides = array<i32>} : memref<1x1x128xf32, #tpu.memory_space<vmem>>, vector<1x1x128xf32>,
    } else {
    }
    %c0_i32_22 = arith.constant 0 : i32
    %55 = arith.cmpi eq, %arg2, %c0_i32_22 : i32
    %56 = arith.extui %55 : i1 to i32
    %c0_i32_23 = arith.constant 0 : i32
    %57 = arith.cmpi ne, %56, %c0_i32_23 : i32
    scf.if %57 {
      %c0_27 = arith.constant 0 : index
      %c0_28 = arith.constant 0 : index
      %63 = vector.load %arg7[%c0_27, %c0_28] : memref<128x1xf32, #tpu.memory_space<vmem>>, vector<128x1xf32>
      %cst_29 = arith.constant 0.000000e+00 : f32
      %64 = vector.broadcast %cst_29 : f32 to vector<128x1xf32>
      %65 = arith.select %30, %63, %64 : vector<128x1xi1>, vector<128x1xf32>
      %66 = vector.shape_cast %65 : vector<128x1xf32> to vector<1x128x1xf32>
      %cst_30 = arith.constant dense<0.000000e+00> : vector<1xf32>
      %67 = vector.multi_reduction <add>, %66, %cst_30 [1, 2] : vector<1x128x1xf32> to vector<1xf32>
      %68 = vector.shape_cast %67 : vector<1xf32> to vector<1x1x1xf32>
      %69 = vector.extract %68[0, 0, 0] : f32 from vector<1x1x1xf32>
      %cst_31 = arith.constant 6.250000e-02 : f32
      %70 = arith.mulf %69, %cst_31 : f32
      %c0_i32_32 = arith.constant 0 : i32
      %71 = arith.cmpi eq, %arg1, %c0_i32_32 : i32
      %72 = arith.extui %71 : i1 to i32
      %c0_i32_33 = arith.constant 0 : i32
      %73 = arith.cmpi ne, %72, %c0_i32_33 : i32
      scf.if %73 {
        %77 = vector.broadcast %70 : f32 to vector<1x8x128xf32>
        %c0_36 = arith.constant 0 : index
        %c0_37 = arith.constant 0 : index
        %c0_38 = arith.constant 0 : index
        %78 = vector.load %arg5[%c0_36, %c0_37, %c0_38] : memref<1x8x128xf32, #tpu.memory_space<vmem>>, vector<1x8x128xf32>
        tpu.vector_store %arg5[%c0_36, %c0_37, %c0_38], %77 {strides = array<i32>} : memref<1x8x128xf32, #tpu.memory_space<vmem>>, vector<1x8x128xf32>,
      } else {
      }
      %c0_i32_34 = arith.constant 0 : i32
      %74 = arith.cmpi sgt, %arg1, %c0_i32_34 : i32
      %75 = arith.extui %74 : i1 to i32
      %c0_i32_35 = arith.constant 0 : i32
      %76 = arith.cmpi ne, %75, %c0_i32_35 : i32
      scf.if %76 {
        %c0_36 = arith.constant 0 : index
        %c0_37 = arith.constant 0 : index
        %c0_38 = arith.constant 0 : index
        %77 = vector.load %arg5[%c0_36, %c0_37, %c0_38] : memref<1x8x128xf32, #tpu.memory_space<vmem>>, vector<1x8x128xf32>
        %78 = vector.broadcast %70 : f32 to vector<1x8x128xf32>
        %79 = arith.addf %77, %78 : vector<1x8x128xf32>
        %c0_39 = arith.constant 0 : index
        %c0_40 = arith.constant 0 : index
        %c0_41 = arith.constant 0 : index
        %80 = vector.load %arg5[%c0_39, %c0_40, %c0_41] : memref<1x8x128xf32, #tpu.memory_space<vmem>>, vector<1x8x128xf32>
        tpu.vector_store %arg5[%c0_39, %c0_40, %c0_41], %79 {strides = array<i32>} : memref<1x8x128xf32, #tpu.memory_space<vmem>>, vector<1x8x128xf32>,
      } else {
      }
    } else {
    }
    %c0_i32_24 = arith.constant 0 : i32
    %58 = arith.cmpi eq, %arg1, %c0_i32_24 : i32
    %c0_i32_25 = arith.constant 0 : i32
    %59 = arith.cmpi eq, %arg2, %c0_i32_25 : i32
    %60 = arith.andi %58, %59 : i1
    %61 = arith.extui %60 : i1 to i32
    %c0_i32_26 = arith.constant 0 : i32
    %62 = arith.cmpi ne, %61, %c0_i32_26 : i32
    scf.if %62 {
      %c0_27 = arith.constant 0 : index
      %c0_28 = arith.constant 0 : index
      %c0_29 = arith.constant 0 : index
      %63 = vector.load %arg8[%c0_27, %c0_28, %c0_29] : memref<1x1x128xf32, #tpu.memory_space<vmem>>, vector<1x1x128xf32>
      %64 = vector.shape_cast %63 : vector<1x1x128xf32> to vector<1x1x1x128xf32>
      %cst_30 = arith.constant dense<0.000000e+00> : vector<1xf32>
      %65 = vector.multi_reduction <add>, %64, %cst_30 [1, 2, 3] : vector<1x1x1x128xf32> to vector<1xf32>
      %66 = vector.shape_cast %65 : vector<1xf32> to vector<1x1x1x1xf32>
      %67 = vector.extract %66[0, 0, 0, 0] : f32 from vector<1x1x1x1xf32>
      %cst_31 = arith.constant 6.250000e-02 : f32
      %68 = arith.mulf %67, %cst_31 : f32
      %69 = vector.broadcast %68 : f32 to vector<1x8x128xf32>
      %c0_32 = arith.constant 0 : index
      %c0_33 = arith.constant 0 : index
      %c0_34 = arith.constant 0 : index
      %70 = vector.load %arg6[%c0_32, %c0_33, %c0_34] : memref<1x8x128xf32, #tpu.memory_space<vmem>>, vector<1x8x128xf32>
      tpu.vector_store %arg6[%c0_32, %c0_33, %c0_34], %69 {strides = array<i32>} : memref<1x8x128xf32, #tpu.memory_space<vmem>>, vector<1x8x128xf32>,
    } else {
    }
    return
  }
  func.func @transform_0(%arg0: i32, %arg1: i32, %arg2: i32) -> (i32, i32, i32) {
    %c0_i32 = arith.constant 0 : i32
    %c0_i32_0 = arith.constant 0 : i32
    return %arg0, %arg2, %c0_i32 : i32, i32, i32
  }
  func.func @transform_1(%arg0: i32, %arg1: i32, %arg2: i32) -> (i32, i32, i32) {
    %c0_i32 = arith.constant 0 : i32
    %c0_i32_0 = arith.constant 0 : i32
    return %arg0, %arg1, %c0_i32 : i32, i32, i32
  }
  func.func @transform_2(%arg0: i32, %arg1: i32, %arg2: i32) -> (i32, i32, i32) {
    %c0_i32 = arith.constant 0 : i32
    %c0_i32_0 = arith.constant 0 : i32
    %c0_i32_1 = arith.constant 0 : i32
    return %arg0, %c0_i32, %c0_i32_0 : i32, i32, i32
  }
  func.func @transform_3(%arg0: i32, %arg1: i32, %arg2: i32) -> (i32, i32, i32) {
    %c0_i32 = arith.constant 0 : i32
    %c0_i32_0 = arith.constant 0 : i32
    %c0_i32_1 = arith.constant 0 : i32
    return %arg0, %c0_i32, %c0_i32_0 : i32, i32, i32
  }
}

</mosaic_0001>

<bundles_post_ra>
// kernel: tpu_custom_call.1
= control target key start
LH: loop header
LB: loop body
LE: loop exit
PB: predicated region body
PF: predicated region fallthrough
CT: control target
= control target key end

     0   :  { %9 = vsyncpa [#allocation5], 0  ;;  %s4367_s0 = inlined_call_operand.vmem [shape: f32[2,128,3], index: 0, kind: input, shape index: {}]   ;;  %s4368_s1 = inlined_call_operand.vmem [shape: f32[2,128,3], index: 1, kind: input, shape index: {}]   ;;  %s4369_s2 = inlined_call_operand.hbm [shape: f32[2,8,128], index: 2, kind: output, shape index: {0}]   ;;  %s4370_s3 = inlined_call_operand.hbm [shape: f32[2,8,128], index: 3, kind: output, shape index: {1}]  }
   0x1   :  { %11 = vsyncpa [#allocation5 + $0x1], 0 }
   0x2   :  { %12 = vsyncpa [#allocation7], 0 }
   0x3   :  { %14 = vsyncpa [#allocation7 + $0x1], 0  ;;  %s3285_s12 = smov 0   ;;  %s3287_s13 = smov 0  }
   0x4   :  { %s3289_s14 = smov 0   ;;  %s3291_s15 = smov 0  }
   0x5   :  { %s3293_s16 = smov 0   ;;  %s3295_s17 = smov 0  }
   0x6 LB: > { %s2530_s18 = sadd.s32 4294967295, %s3261_s17   ;;  %s2531_s19 = sadd.s32 4294967294, %s3261_s17   ;;  %s3261_s17 = sphi %s3295_s17, %s20_s17   ;;  %s3257_s16 = sphi %s3293_s16, %s4563_s16   ;;  %s3253_s15 = sphi %s3291_s15, %s4562_s15   ;;  %s3249_s14 = sphi %s3289_s14, %s4561_s14   ;;  %s3245_s13 = sphi %s3287_s13, %s4560_s13   ;;  %s3241_s12 = sphi %s3285_s12, %s4559_s12  }
   0x7   : > { %s39_s20 = sadd.s32 1, %s3257_s16  ;;  %s102_s21 = sadd.s32 1, %s3249_s14 }
   0x8   : > { %p41_p0 = scmp.ge.s32.totalorder %s39_s20, 2  ;;  %p112_p1 = scmp.ne.s32.totalorder %s3249_s14, %s3245_s13 }
   0x9   : > { %p113_p2 = scmp.eq.s32.totalorder %s2530_s18, 1  ;;  %p118_p3 = scmp.ne.s32.totalorder %s3245_s13, %s3241_s12 }
   0xa   : > { %s4565_s20 = smov (%p41_p0, %s39_s20), 0  ;;  %p119_p5 = scmp.eq.s32.totalorder %s2531_s19, 1 }
   0xb   : > { %p3325_p4 = por %p113_p2, %p112_p1  ;;  %s99_s23 = ssub.s32 %s3257_s16, %s4565_s20 }
   0xc   : > { %p2534_p6 = scmp.ge.s32.totalorder %s3261_s17, 1  ;;  %p100_p7 = scmp.eq.s32.totalorder %s99_s23, 0 }
   0xd   : > { %p3332_p8 = por %p119_p5, %p118_p3  ;;  %p189_p9 = scmp.lt.s32.totalorder %s3261_s17, 3 }
   0xe   : > { %s3338_s25 = scalar_select %p100_p7, %s3249_s14, %s102_s21  }
   0xf   : > { %p190_p10 = pnand %p2534_p6, %p189_p9 }
  0x11   : > { %193 = sbr.rel (%p190_p10) target bundleno = 827 (0x33b), region = 28 }
  0x16   : > { %p232_p11 = scmp.lt.s32.totalorder %s3253_s15, 1  ;;  %vm283_vm0 = vcmask 23552   ;;  %vm1821_vm1 = vcmask 130112   ;;  %vm1828_vm2 = vcmask 195712   ;;  %vm1835_vm3 = vcmask 261312   ;;  %s4285_s7 = sand.u32 1, %s3245_s13  }
  0x17   : > { %vm1842_vm4 = vcmask 326912   ;;  %vm1849_vm5 = vcmask 392512   ;;  %vm1856_vm6 = vcmask 458112   ;;  %vm1863_vm7 = vcmask 523712   ;;  %s2535_s8 = sshll.u32 %s4285_s7, 3  ;;  %s2543_s9 = sshll.u32 %s3253_s15, 7 }
  0x18   : > { %s3342_s26 = scalar_select %p232_p11, %s3253_s15, 1  ;;  %vm1870_vm8 = vcmask 589312   ;;  %vm1877_vm9 = vcmask 654912   ;;  %vm1884_vm10 = vcmask 720512   ;;  %vm1891_vm11 = vcmask 786112  }
  0x19   : > { %vm1898_vm12 = vcmask 851712   ;;  %vm1905_vm13 = vcmask 917312   ;;  %vm1912_vm14 = vcmask 982912   ;;  %vm1919_vm15 = vcmask 1048512   ;;  %s230_s10 = scalar_lea.vmem [#allocation6], %s2535_s8  ;;  %s4292_s21 = scalar_lea.hbm %s4369_s2, %s2543_s9 }
  0x1a   : > { %s2547_s27 = sshll.u32 %s3342_s26, 7  ;;  %s2402_s11 = sshll.u32 %s230_s10, 4  ;;  %s4301_s11 = int_to_ptr.vmem [resolvable:$true] %s2402_s11 }
  0x1b   : > { %s3350_s30 = scalar_lea.vmem %s4367_s0, %s2547_s27  ;;  %s3462_s6 = scalar_lea.vmem %s4368_s1, %s2547_s27 }
  0x1c   : > { %v3353_v0 = vld [vmem:[%s3350_s30 + $0x78] sm:$0xff]  ;;  %v3356_v1 = vld [vmem:[%s3350_s30 + $0x70] sm:$0xff]  ;;  %v3359_v2 = vld [vmem:[%s3350_s30 + $0x68] sm:$0xff]  ;;  %s223_s23 = scalar_lea.vmem [#allocation4], %s2535_s8  ;;  %s4299_s5 = scalar_lea.hbm %s4370_s3, %s2543_s9 }
  0x1d   : > { %4454 = vst [vmem:[#allocation10_spill] sm:$0xff] %v3353_v0  ;;  %4455 = vst [vmem:[#allocation11_spill] sm:$0xff] %v3356_v1  ;;  %v378_v3 = vsel %vm283_vm0, %v3353_v0, 0  ;;  %v375_v4 = vsel %vm283_vm0, %v3356_v1, 0  ;;  %v372_v5 = vsel %vm283_vm0, %v3359_v2, 0  ;;  %v3368_v6 = vld [vmem:[%s3350_s30 + $0x60] sm:$0xff] }
  0x1e   : > { %4456 = vst [vmem:[#allocation12_spill] sm:$0xff] %v3359_v2  ;;  %4457 = vst [vmem:[#allocation13_spill] sm:$0xff] %v3368_v6  ;;  %v3371_v7 = vld [vmem:[%s3350_s30 + $0x58] sm:$0xff]  ;;  %v3373_v8 = vand.u32 4294901760, %v378_v3  ;;  %v3375_v9 = vand.u32 4294901760, %v375_v4  ;;  %v3377_v10 = vand.u32 4294901760, %v372_v5 }
  0x1f   : > { %4458 = vst [vmem:[#allocation14_spill] sm:$0xff] %v3371_v7  ;;  %v369_v11 = vsel %vm283_vm0, %v3368_v6, 0  ;;  %v3382_v12 = vld [vmem:[%s3350_s30 + $0x50] sm:$0xff]  ;;  %v366_v14 = vsel %vm283_vm0, %v3371_v7, 0  ;;  %v3417_v24 = vld [vmem:[%s3350_s30 + $0x48] sm:$0xff]  ;;  %v3438_v34 = vld [vmem:[%s3350_s30 + $0x40] sm:$0xff] }
  0x20   : > { %4459 = vst [vmem:[#allocation15_spill] sm:$0xff] %v3382_v12  ;;  %v3384_v13 = vand.u32 4294901760, %v369_v11  ;;  %2741 = vmatprep.subr.mxu0 %v3373_v8  ;;  %v3390_v15 = vsub.f32 %v378_v3, %v3373_v8  ;;  %v3393_v16 = vsub.f32 %v375_v4, %v3375_v9  ;;  %v3396_v17 = vsub.f32 %v372_v5, %v3377_v10  ;;  %v3455_v41 = vld [vmem:[%s3350_s30 + $0x38] sm:$0xff]  ;;  %v3479_v48 = vld [vmem:[%s3462_s6] sm:$0xff]  ;;  %v3482_v49 = vld [vmem:[%s3350_s30 + $0x30] sm:$0xff]  ;;  %s2389_s26 = sshll.u32 %s223_s23, 4  ;;  %s4294_s26 = int_to_ptr.vmem [resolvable:$true] %s2389_s26 }
  0x21   : > { %2742 = vmatpush3.xpose.msra.mxu0 %v3373_v8  ;;  %v3399_v18 = vand.u32 4294901760, %v366_v14  ;;  %v363_v19 = vsel %vm283_vm0, %v3382_v12, 0  ;;  %4463 = vst [vmem:[#allocation19_spill] sm:$0xff] %v3417_v24  ;;  %v360_v28 = vsel %vm283_vm0, %v3417_v24, 0  ;;  %4465 = vst [vmem:[#allocation21_spill] sm:$0xff] %v3438_v34  ;;  %v357_v40 = vsel %vm283_vm0, %v3438_v34, 0 }
  0x22   : > { %2743 = vmatprep.subr.mxu0 %v3375_v9  ;;  %v3405_v20 = vand.u32 4294901760, %v3390_v15  ;;  %v3408_v21 = vand.u32 4294901760, %v3393_v16  ;;  %v3411_v22 = vand.u32 4294901760, %v3396_v17  ;;  %v3414_v23 = vsub.f32 %v369_v11, %v3384_v13  ;;  %4468 = vst [vmem:[#allocation24_spill] sm:$0xff] %v3479_v48  ;;  %v3501_v57 = vld [vmem:[%s3350_s30 + $0x28] sm:$0xff]  ;;  %v3524_v5 = vld [vmem:[%s3350_s30 + $0x20] sm:$0xff] }
  0x23   : > { %v3424_v27 = vand.u32 4294901760, %v363_v19  ;;  %v3429_v29 = vsub.f32 %v366_v14, %v3399_v18  ;;  %v3441_v35 = vand.u32 4294901760, %v360_v28  ;;  %v3474_v46 = vand.u32 4294901760, %v357_v40  ;;  %v274_v6 = vld [vmem:[%s3462_s6 + $0x38] sm:$0xff]  ;;  %v277_v7 = vld [vmem:[%s3462_s6 + $0x50] sm:$0xff]  ;;  %s3155_s8 = scalar_lea.vmem %s4294_s26, 128 }
  0x24   : > { %4460 = vst [vmem:[#allocation16_spill] sm:$0xff] %v3405_v20  ;;  %4461 = vst [vmem:[#allocation17_spill] sm:$0xff] %v3408_v21  ;;  %v625_v25 = vsub.f32 %v3390_v15, %v3405_v20  ;;  %v632_v26 = vsub.f32 %v3393_v16, %v3408_v21  ;;  %v639_v32 = vsub.f32 %v3396_v17, %v3411_v22  ;;  %v3435_v33 = vand.u32 4294901760, %v3414_v23  ;;  %v271_v21 = vld [vmem:[%s3462_s6 + $0x20] sm:$0xff]  ;;  %p3156_p12 = scmp.ne.s32.totalorder %s4294_s26, %s3155_s8  ;;  %s3263_s18 = smov [#allocation4]  }
  0x25   : > { %4462 = vst [vmem:[#allocation18_spill] sm:$0xff] %v3411_v22  ;;  %2744 = vmatpush3.xpose.msra.mxu0 %v3375_v9  ;;  %v3444_v36 = vsub.f32 %v363_v19, %v3424_v27  ;;  %v3450_v39 = vand.u32 4294901760, %v3429_v29  ;;  %v3469_v43 = vsub.f32 %v360_v28, %v3441_v35  ;;  %v354_v47 = vsel %vm283_vm0, %v3455_v41, 0  ;;  %s3159_s19 = sshll.u32 %s3263_s18, 4  ;;  %s3160_s19 = int_to_ptr.vmem [resolvable:$false] %s3159_s19 }
  0x26   : > { %2745 = vmatprep.subr.mxu0 %v3377_v10  ;;  %v626_v30 = vand.u32 4294901760, %v625_v25  ;;  %v633_v31 = vand.u32 4294901760, %v632_v26  ;;  %4464 = vst [vmem:[#allocation20_spill] sm:$0xff] %v3435_v33  ;;  %v640_v37 = vand.u32 4294901760, %v639_v32  ;;  %v646_v38 = vsub.f32 %v3414_v23, %v3435_v33  ;;  %v3545_v32 = vld [vmem:[%s3350_s30 + $0x18] sm:$0xff]  ;;  %p3157_p13 = pnand %p3156_p12, %p3325_p4  ;;  %p3162_p1 = scmp.lt.s32.totalorder %s4294_s26, %s3160_s19 }
  0x27   : > { %4466 = vst [vmem:[#allocation22_spill] sm:$0xff] %v3450_v39  ;;  %v3466_v42 = vand.u32 4294901760, %v3444_v36  ;;  %v653_v45 = vsub.f32 %v3429_v29, %v3450_v39  ;;  %v3487_v51 = vand.u32 4294901760, %v354_v47  ;;  %v3490_v52 = vand.u32 4294901760, %v3469_v43 }
  0x28   : > { %2797 = vmatprep.subr.mxu1 %v626_v30  ;;  %v647_v44 = vand.u32 4294901760, %v646_v38  ;;  %v285_v53 = vsel %vm283_vm0, %v3479_v48, 0  ;;  %v351_v55 = vsel %vm283_vm0, %v3482_v49, 0  ;;  %v3498_v56 = vsub.f32 %v357_v40, %v3474_v46  ;;  %p3158_p0 = pneg %p3157_p13 }
  0x29   : > { %2746 = vmatpush3.xpose.msra.mxu0 %v3377_v10  ;;  %2798 = vmatpush3.xpose.msra.mxu1 %v626_v30  ;;  %4467 = vst [vmem:[#allocation23_spill] sm:$0xff] %v3466_v42  ;;  %v660_v50 = vsub.f32 %v3444_v36, %v3466_v42  ;;  %4469 = vst [vmem:[#allocation25_spill] sm:$0xff] %v3490_v52  ;;  %v654_v54 = vand.u32 4294901760, %v653_v45  ;;  %v3503_v58 = vand.u32 4294901760, %v285_v53  ;;  %v3510_v61 = vand.u32 4294901760, %v351_v55 }
  0x2a   : > { %2747 = vmatprep.subr.mxu0 %v3384_v13  ;;  %2799 = vmatprep.subr.mxu1 %v633_v31  ;;  %v348_v62 = vsel %vm283_vm0, %v3501_v57, 0  ;;  %v667_v63 = vsub.f32 %v3469_v43, %v3490_v52  ;;  %v3518_v3 = vand.u32 4294901760, %v3498_v56  ;;  %v3521_v4 = vsub.f32 %v354_v47, %v3487_v51 }
  0x2b   : > { %4470 = vst [vmem:[#allocation26_spill] sm:$0xff] %v3503_v58  ;;  %v3506_v59 = vsub.f32 %v285_v53, %v3503_v58  ;;  %2829 = vmatprep.mubr.f32.mxu1 %v3503_v58  ;;  %v661_v60 = vand.u32 4294901760, %v660_v50  ;;  %4471 = vst [vmem:[#allocation27_spill] sm:$0xff] %v3510_v61  ;;  %v3531_v19 = vand.u32 4294901760, %v348_v62  ;;  %v345_v25 = vsel %vm283_vm0, %v3524_v5, 0  ;;  %v3562_v53 = vld [vmem:[%s3350_s30 + $0x10] sm:$0xff] }
  0x2c   : > { %4472 = vst [vmem:[#allocation28_spill] sm:$0xff] %v3518_v3  ;;  %v3536_v26 = vsub.f32 %v351_v55, %v3510_v61  ;;  %v668_v28 = vand.u32 4294901760, %v667_v63  ;;  %v674_v30 = vsub.f32 %v3498_v56, %v3518_v3  ;;  %v3548_v38 = vand.u32 4294901760, %v345_v25  ;;  %v3599_v58 = vld [vmem:[%s3350_s30] sm:$0xff] }
  0x2d   : > { %2748 = vmatpush3.xpose.msra.mxu0 %v3384_v13  ;;  %2800 = vmatpush3.xpose.msra.mxu1 %v633_v31  ;;  %v4371_v11 = vand.u32 4294901760, %v3506_v59  ;;  %4473 = vst [vmem:[#allocation29_spill] sm:$0xff] %v3531_v19  ;;  %v3542_v31 = vand.u32 4294901760, %v3521_v4  ;;  %v342_v40 = vsel %vm283_vm0, %v3545_v32, 0  ;;  %v3559_v50 = vsub.f32 %v348_v62, %v3531_v19 }
  0x2e   : > { %2749 = vmatprep.subr.mxu0 %v3399_v18  ;;  %2801 = vmatprep.subr.mxu1 %v640_v37  ;;  %4475 = vst [vmem:[#allocation31_spill] sm:$0xff] %v3548_v38  ;;  %v3556_v47 = vand.u32 4294901760, %v3536_v26  ;;  %v339_v55 = vsel %vm283_vm0, %v3562_v53, 0  ;;  %v333_v39 = vsel %vm283_vm0, %v3599_v58, 0 }
  0x2f   : > { %v464_v14 = vsub.f32 %v3506_v59, %v4371_v11  ;;  %4474 = vst [vmem:[#allocation30_spill] sm:$0xff] %v3542_v31  ;;  %v681_v45 = vsub.f32 %v3521_v4, %v3542_v31  ;;  %v3573_v63 = vand.u32 4294901760, %v3559_v50 }
  0x30   : > { %4476 = vst [vmem:[#allocation32_spill] sm:$0xff] %v3556_v47  ;;  %v688_v62 = vsub.f32 %v3536_v26, %v3556_v47 }
  0x31   : > { %2750 = vmatpush3.xpose.msra.mxu0 %v3399_v18  ;;  %2802 = vmatpush3.xpose.msra.mxu1 %v640_v37  ;;  %v465_v37 = vand.u32 4294901760, %v464_v14  ;;  %4478 = vst [vmem:[#allocation34_spill] sm:$0xff] %v3573_v63  ;;  %v3576_v14 = vsub.f32 %v345_v25, %v3548_v38  ;;  %v695_v11 = vsub.f32 %v3559_v50, %v3573_v63  ;;  %v269_v63 = vld [vmem:[%s3462_s6 + $0x10] sm:$0xff] }
  0x32   : > { %2751 = vmatprep.subr.mxu0 %v3424_v27  ;;  %2803 = vmatprep.subr.mxu1 %v647_v44  ;;  %v291_v22 = vsel %vm283_vm0, %v269_v63, 0  ;;  %v3632_v63 = vand.u32 4294901760, %v333_v39 }
  0x33   : > { %2773 = vmatprep.mubr.f32.mxu0 %v465_v37  ;;  %4479 = vst [vmem:[#allocation35_spill] sm:$0xff] %v3576_v14  ;;  %v3590_v25 = vand.u32 4294901760, %v3576_v14 }
  0x34   : > { %4488 = vst [vmem:[#allocation44_spill] sm:$0xff] %v3632_v63 }
  0x35   : > { %2752 = vmatpush3.xpose.msra.mxu0 %v3424_v27  ;;  %2804 = vmatpush3.xpose.msra.mxu1 %v647_v44  ;;  %v675_v44 = vand.u32 4294901760, %v674_v30  ;;  %v3582_v30 = vand.u32 4294901760, %v339_v55  ;;  %4481 = vst [vmem:[#allocation37_spill] sm:$0xff] %v3590_v25  ;;  %v702_v3 = vsub.f32 %v3576_v14, %v3590_v25 }
  0x36   : > { %2753 = vmatprep.subr.mxu0 %v3441_v35  ;;  %2805 = vmatprep.subr.mxu1 %v654_v54 }
  0x37   : > { %4480 = vst [vmem:[#allocation36_spill] sm:$0xff] %v3582_v30  ;;  %v3614_v42 = vsub.f32 %v339_v55, %v3582_v30  ;;  %v272_v55 = vld [vmem:[%s3462_s6 + $0x28] sm:$0xff]  ;;  %v703_v20 = vand.u32 4294901760, %v702_v3  ;;  %v273_v3 = vld [vmem:[%s3462_s6 + $0x30] sm:$0xff] }
  0x38   : > { %v300_v0 = vsel %vm283_vm0, %v272_v55, 0  ;;  %v303_v2 = vsel %vm283_vm0, %v273_v3, 0 }
  0x39   : > { %2754 = vmatpush3.xpose.msra.mxu0 %v3441_v35  ;;  %2806 = vmatpush3.xpose.msra.mxu1 %v654_v54  ;;  %v3565_v54 = vand.u32 4294901760, %v342_v40  ;;  %4486 = vst [vmem:[#allocation42_spill] sm:$0xff] %v3614_v42  ;;  %v3682_v12 = vand.u32 4294901760, %v303_v2 }
  0x3a   : > { %2755 = vmatprep.subr.mxu0 %v3474_v46  ;;  %2807 = vmatprep.subr.mxu1 %v661_v60 }
  0x3b   : > { %4477 = vst [vmem:[#allocation33_spill] sm:$0xff] %v3565_v54  ;;  %v3593_v47 = vsub.f32 %v342_v40, %v3565_v54  ;;  %v696_v40 = vand.u32 4294901760, %v695_v11 }
  0x3d   : > { %2756 = vmatpush3.xpose.msra.mxu0 %v3474_v46  ;;  %2808 = vmatpush3.xpose.msra.mxu1 %v661_v60  ;;  %v682_v60 = vand.u32 4294901760, %v681_v45  ;;  %v689_v45 = vand.u32 4294901760, %v688_v62  ;;  %4482 = vst [vmem:[#allocation38_spill] sm:$0xff] %v3593_v47  ;;  %v3611_v52 = vand.u32 4294901760, %v3593_v47 }
  0x3e   : > { %2757 = vmatprep.subr.mxu0 %v3487_v51  ;;  %2809 = vmatprep.subr.mxu1 %v668_v28 }
  0x3f   : > { %4485 = vst [vmem:[#allocation41_spill] sm:$0xff] %v3611_v52  ;;  %v709_v48 = vsub.f32 %v3593_v47, %v3611_v52 }
  0x41   : > { %2758 = vmatpush3.xpose.msra.mxu0 %v3487_v51  ;;  %2810 = vmatpush3.xpose.msra.mxu1 %v668_v28  ;;  %v3579_v28 = vld [vmem:[%s3350_s30 + $0x8] sm:$0xff] }
  0x42   : > { %2759 = vmatprep.subr.mxu0 %v3510_v61  ;;  %2811 = vmatprep.subr.mxu1 %v675_v44  ;;  %v336_v37 = vsel %vm283_vm0, %v3579_v28, 0 }
  0x43   : > { %v3602_v31 = vand.u32 4294901760, %v336_v37 }
  0x45   : > { %2760 = vmatpush3.xpose.msra.mxu0 %v3510_v61  ;;  %2812 = vmatpush3.xpose.msra.mxu1 %v675_v44  ;;  %v3596_v44 = vld [vmem:[%s3462_s6 + $0x8] sm:$0xff]  ;;  %4484 = vst [vmem:[#allocation40_spill] sm:$0xff] %v3602_v31  ;;  %v3625_v11 = vsub.f32 %v336_v37, %v3602_v31  ;;  %v297_v37 = vsel %vm283_vm0, %v271_v21, 0  ;;  %v710_v21 = vand.u32 4294901760, %v709_v48 }
  0x46   : > { %2761 = vmatprep.subr.mxu0 %v3531_v19  ;;  %2813 = vmatprep.subr.mxu1 %v682_v60  ;;  %4483 = vst [vmem:[#allocation39_spill] sm:$0xff] %v3596_v44  ;;  %v288_v62 = vsel %vm283_vm0, %v3596_v44, 0  ;;  %v3635_v44 = vand.u32 4294901760, %v3614_v42  ;;  %v3658_v55 = vand.u32 4294901760, %v297_v37 }
  0x47   : > { %v3619_v33 = vand.u32 4294901760, %v288_v62  ;;  %4487 = vst [vmem:[#allocation43_spill] sm:$0xff] %v3625_v11  ;;  %v3649_v52 = vand.u32 4294901760, %v3625_v11 }
  0x48   : > { %4489 = vst [vmem:[#allocation45_spill] sm:$0xff] %v3635_v44 }
  0x49   : > { %2762 = vmatpush3.xpose.msra.mxu0 %v3531_v19  ;;  %2814 = vmatpush3.xpose.msra.mxu1 %v682_v60  ;;  %v270_v60 = vld [vmem:[%s3462_s6 + $0x18] sm:$0xff]  ;;  %4491 = vst [vmem:[#allocation47_spill] sm:$0xff] %v3649_v52 }
  0x4a   : > { %2763 = vmatprep.subr.mxu0 %v3548_v38  ;;  %2815 = vmatprep.subr.mxu1 %v689_v45  ;;  %v294_v25 = vsel %vm283_vm0, %v270_v60, 0  ;;  %v3641_v60 = vsub.f32 %v288_v62, %v3619_v33  ;;  %v716_v62 = vsub.f32 %v3614_v42, %v3635_v44  ;;  %v306_v44 = vsel %vm283_vm0, %v274_v6, 0  ;;  %v275_v42 = vld [vmem:[%s3462_s6 + $0x40] sm:$0xff]  ;;  %v276_v6 = vld [vmem:[%s3462_s6 + $0x48] sm:$0xff] }
  0x4b   : > { %v3643_v1 = vand.u32 4294901760, %v294_v25 }
  0x4c   : > { %4490 = vst [vmem:[#allocation46_spill] sm:$0xff] %v3641_v60 }
  0x4d   : > { %2764 = vmatpush3.xpose.msra.mxu0 %v3548_v38  ;;  %2816 = vmatpush3.xpose.msra.mxu1 %v689_v45  ;;  %v3637_v45 = vand.u32 4294901760, %v291_v22  ;;  %v3656_v38 = vsub.f32 %v333_v39, %v3632_v63  ;;  %v3668_v48 = vsub.f32 %v294_v25, %v3643_v1  ;;  %v717_v39 = vand.u32 4294901760, %v716_v62 }
  0x4e   : > { %2765 = vmatprep.subr.mxu0 %v3565_v54  ;;  %2817 = vmatprep.subr.mxu1 %v696_v40  ;;  %v3680_v25 = vsub.f32 %v297_v37, %v3658_v55  ;;  %v4498_v62 = vand.u32 4294901760, %v3641_v60 }
  0x4f   : > { %4492 = vst [vmem:[#allocation48_spill] sm:$0xff] %v3656_v38  ;;  %4494 = vst [vmem:[#allocation50_spill] sm:$0xff] %v3668_v48  ;;  %v3677_v3 = vand.u32 4294901760, %v3656_v38 }
  0x50   : > { %4496 = vst [vmem:[#allocation52_spill] sm:$0xff] %v3680_v25  ;;  %v474_v19 = vsub.f32 %v3641_v60, %v4498_v62  ;;  %v3704_v62 = vsub.f32 %v303_v2, %v3682_v12  ;;  %v278_v60 = vld [vmem:[%s3462_s6 + $0x58] sm:$0xff] }
  0x51   : > { %2766 = vmatpush3.xpose.msra.mxu0 %v3565_v54  ;;  %2818 = vmatpush3.xpose.msra.mxu1 %v696_v40  ;;  %v3661_v54 = vsub.f32 %v291_v22, %v3637_v45  ;;  %v3663_v40 = vand.u32 4294901760, %v300_v0  ;;  %v723_v22 = vsub.f32 %v3625_v11, %v3649_v52  ;;  %4495 = vst [vmem:[#allocation51_spill] sm:$0xff] %v3677_v3  ;;  %v3689_v52 = vand.u32 4294901760, %v306_v44 }
  0x52   : > { %2767 = vmatprep.subr.mxu0 %v3582_v30  ;;  %2819 = vmatprep.subr.mxu1 %v703_v20  ;;  %v309_v11 = vsel %vm283_vm0, %v275_v42, 0  ;;  %v475_v34 = vand.u32 4294901760, %v474_v19  ;;  %v4501_v19 = vand.u32 4294901760, %v3680_v25 }
  0x53   : > { %4493 = vst [vmem:[#allocation49_spill] sm:$0xff] %v3661_v54  ;;  %v724_v47 = vand.u32 4294901760, %v723_v22  ;;  %v3706_v37 = vand.u32 4294901760, %v309_v11 }
  0x55   : > { %2768 = vmatpush3.xpose.msra.mxu0 %v3582_v30  ;;  %2820 = vmatpush3.xpose.msra.mxu1 %v703_v20  ;;  %v3687_v20 = vsub.f32 %v300_v0, %v3663_v40  ;;  %v312_v30 = vsel %vm283_vm0, %v276_v6, 0  ;;  %v730_v0 = vsub.f32 %v3656_v38, %v3677_v3  ;;  %v4500_v3 = vand.u32 4294901760, %v3668_v48 }
  0x56   : > { %2769 = vmatprep.subr.mxu0 %v3602_v31  ;;  %2821 = vmatprep.subr.mxu1 %v710_v21  ;;  %v3719_v2 = vand.u32 4294901760, %v312_v30  ;;  %v315_v38 = vsel %vm283_vm0, %v277_v7, 0  ;;  %v504_v6 = vsub.f32 %v3680_v25, %v4501_v19  ;;  %v280_v7 = vld [vmem:[%s3462_s6 + $0x68] sm:$0xff] }
  0x57   : > { %4497 = vst [vmem:[#allocation53_spill] sm:$0xff] %v3687_v20  ;;  %v494_v42 = vsub.f32 %v3668_v48, %v4500_v3  ;;  %v3731_v48 = vsub.f32 %v309_v11, %v3706_v37 }
  0x58   : > { %v3741_v19 = vsub.f32 %v312_v30, %v3719_v2  ;;  %v505_v61 = vand.u32 4294901760, %v504_v6 }
  0x59   : > { %2770 = vmatpush3.xpose.msra.mxu0 %v3602_v31  ;;  %2822 = vmatpush3.xpose.msra.mxu1 %v710_v21  ;;  %v4499_v21 = vand.u32 4294901760, %v3661_v54  ;;  %v3714_v31 = vsub.f32 %v306_v44, %v3689_v52  ;;  %v731_v44 = vand.u32 4294901760, %v730_v0  ;;  %v3738_v0 = vand.u32 4294901760, %v315_v38 }
  0x5a   : > { %2771 = vmatprep.subr.mxu0 %v3632_v63  ;;  %2823 = vmatprep.subr.mxu1 %v717_v39  ;;  %v495_v14 = vand.u32 4294901760, %v494_v42  ;;  %v543_v30 = vand.u32 4294901760, %v3731_v48  ;;  %v4450_v6 = vand.u32 4294901760, %v3741_v19 }
  0x5b   : > { %v484_v22 = vsub.f32 %v3661_v54, %v4499_v21  ;;  %v318_v21 = vsel %vm283_vm0, %v278_v60, 0  ;;  %v279_v54 = vld [vmem:[%s3462_s6 + $0x60] sm:$0xff] }
  0x5c   : > { %v3743_v3 = vand.u32 4294901760, %v318_v21  ;;  %v321_v11 = vsel %vm283_vm0, %v279_v54, 0  ;;  %v3759_v54 = vsub.f32 %v315_v38, %v3738_v0 }
  0x5d   : > { %2772 = vmatpush3.xpose.msra.mxu0 %v3632_v63  ;;  %2824 = vmatpush3.xpose.msra.mxu1 %v717_v39  ;;  %v485_v63 = vand.u32 4294901760, %v484_v22  ;;  %v4502_v39 = vand.u32 4294901760, %v3687_v20  ;;  %v324_v22 = vsel %vm283_vm0, %v280_v7, 0  ;;  %v3761_v7 = vand.u32 4294901760, %v321_v11 }
  0x5e   : > { %2825 = vmatprep.subr.mxu1 %v724_v47  ;;  %2853 = vmatprep.subr.mxu0 %v3390_v15  ;;  %v3765_v24 = vsub.f32 %v318_v21, %v3743_v3 }
  0x5f   : > { %v514_v60 = vsub.f32 %v3687_v20, %v4502_v39  ;;  %v281_v39 = vld [vmem:[%s3462_s6 + $0x70] sm:$0xff]  ;;  %v282_v20 = vld [vmem:[%s3462_s6 + $0x78] sm:$0xff] }
  0x60   : > { %2774 = vmatmul.mubr.f32.vlgmr.msra.gmra.mxu0 %v475_v34  ;;  %v4503_v34 = vand.u32 4294901760, %v3704_v62 }
  0x61   : > { %2826 = vmatpush3.xpose.msra.mxu1 %v724_v47  ;;  %2854 = vmatpush3.xpose.msra.mxu0 %v3390_v15  ;;  %v515_v25 = vand.u32 4294901760, %v514_v60  ;;  %v4504_v47 = vand.u32 4294901760, %v3714_v31  ;;  %v330_v60 = vsel %vm283_vm0, %v282_v20, 0  ;;  %v4451_v20 = vand.u32 4294901760, %v3765_v24 }
  0x62   : > { %2827 = vmatprep.subr.mxu1 %v731_v44  ;;  %2855 = vmatprep.subr.mxu0 %v3393_v16  ;;  %v524_v42 = vsub.f32 %v3704_v62, %v4503_v34  ;;  %v3767_v34 = vand.u32 4294901760, %v324_v22 }
  0x63   : > { %2776 = vmatprep.mubr.f32.mxu0 %v485_v63  ;;  %v534_v15 = vsub.f32 %v3714_v31, %v4504_v47  ;;  %v327_v63 = vsel %vm283_vm0, %v281_v39, 0  ;;  %v563_v47 = vand.u32 4294901760, %v3759_v54  ;;  %v3779_v39 = vsub.f32 %v321_v11, %v3761_v7 }
  0x64   : > { %2777 = vmatmul.mubr.f32.gmra.mxu0 %v495_v14  ;;  %v525_v38 = vand.u32 4294901760, %v524_v42  ;;  %v544_v14 = vsub.f32 %v3731_v48, %v543_v30  ;;  %v3789_v42 = vsub.f32 %v324_v22, %v3767_v34 }
  0x65   : > { %2828 = vmatpush3.xpose.msra.mxu1 %v731_v44  ;;  %2856 = vmatpush3.xpose.msra.mxu0 %v3393_v16  ;;  %v535_v21 = vand.u32 4294901760, %v534_v15  ;;  %v3781_v44 = vand.u32 4294901760, %v327_v63  ;;  %v554_v16 = vsub.f32 %v3741_v19, %v4450_v6  ;;  %v564_v11 = vsub.f32 %v3759_v54, %v563_v47 }
  0x66   : > { %2857 = vmatprep.subr.mxu0 %v3396_v17  ;;  %2909 = vmatprep.subr.mxu1 %v3373_v8  ;;  %v583_v22 = vand.u32 4294901760, %v3779_v39  ;;  %v574_v6 = vsub.f32 %v3765_v24, %v4451_v20 }
  0x67   : > { %2779 = vmatprep.mubr.f32.mxu0 %v505_v61  ;;  %v3791_v61 = vand.u32 4294901760, %v330_v60  ;;  %v3803_v15 = vsub.f32 %v327_v63, %v3781_v44  ;;  %v565_v63 = vand.u32 4294901760, %v564_v11 }
  0x68   : > { %2830 = vmatmul.mubr.f32.vlgmr.msra.gmra.mxu1 %v3619_v33  ;;  %2780 = vmatmul.mubr.f32.gmra.mxu0 %v515_v25  ;;  %v545_v25 = vand.u32 4294901760, %v544_v14 }
  0x69   : > { %2858 = vmatpush3.xpose.msra.mxu0 %v3396_v17  ;;  %2910 = vmatpush3.xpose.msra.mxu1 %v3373_v8  ;;  %v555_v17 = vand.u32 4294901760, %v554_v16  ;;  %v3811_v14 = vsub.f32 %v330_v60, %v3791_v61  ;;  %v603_v16 = vand.u32 4294901760, %v3803_v15 }
  0x6a   : > { %2859 = vmatprep.subr.mxu0 %v3414_v23  ;;  %2911 = vmatprep.subr.mxu1 %v3375_v9 }
  0x6b   : > { %2832 = vmatprep.mubr.f32.mxu1 %v3637_v45  ;;  %2782 = vmatprep.mubr.f32.mxu0 %v525_v38  ;;  %v593_v38 = vand.u32 4294901760, %v3789_v42  ;;  %v613_v20 = vand.u32 4294901760, %v3811_v14 }
  0x6c   : > { %2833 = vmatmul.mubr.f32.gmra.mxu1 %v3643_v1  ;;  %2783 = vmatmul.mubr.f32.gmra.mxu0 %v535_v21  ;;  %v584_v21 = vsub.f32 %v3779_v39, %v583_v22 }
  0x6d   : > { %2860 = vmatpush3.xpose.msra.mxu0 %v3414_v23  ;;  %2912 = vmatpush3.xpose.msra.mxu1 %v3375_v9  ;;  %v575_v23 = vand.u32 4294901760, %v574_v6  ;;  %v594_v60 = vsub.f32 %v3789_v42, %v593_v38  ;;  %v604_v6 = vsub.f32 %v3803_v15, %v603_v16 }
  0x6e   : > { %2861 = vmatprep.subr.mxu0 %v3429_v29  ;;  %2913 = vmatprep.subr.mxu1 %v3377_v10 }
  0x6f   : > { %2835 = vmatprep.mubr.f32.mxu1 %v3658_v55  ;;  %2785 = vmatprep.mubr.f32.mxu0 %v545_v25  ;;  %v585_v25 = vand.u32 4294901760, %v584_v21  ;;  %v595_v11 = vand.u32 4294901760, %v594_v60  ;;  %v1666_v21 = vmul.f32 %v3599_v58, %v3599_v58  ;;  %v1667_v58 = vmul.f32 %v3579_v28, %v3579_v28 }
  0x70   : > { %2836 = vmatmul.mubr.f32.gmra.mxu1 %v3663_v40  ;;  %2786 = vmatmul.mubr.f32.gmra.mxu0 %v555_v17  ;;  %v605_v17 = vand.u32 4294901760, %v604_v6  ;;  %v1673_v60 = vmul.f32 %v3455_v41, %v3455_v41  ;;  %v4506_v6 = vld [vmem:[#allocation19_spill] sm:$0xff] }
  0x71   : > { %2862 = vmatpush3.xpose.msra.mxu0 %v3429_v29  ;;  %2914 = vmatpush3.xpose.msra.mxu1 %v3377_v10  ;;  %v614_v29 = vsub.f32 %v3811_v14, %v613_v20  ;;  %v1685_v28 = vsel %vm283_vm0, %v1667_v58, 0.0  ;;  %v4513_v58 = vld [vmem:[#allocation15_spill] sm:$0xff] }
  0x72   : > { %2863 = vmatprep.subr.mxu0 %v3444_v36  ;;  %2915 = vmatprep.subr.mxu1 %v3384_v13  ;;  %v1703_v41 = vsel %vm283_vm0, %v1673_v60, 0.0  ;;  %v4516_v60 = vld [vmem:[#allocation31_spill] sm:$0xff] }
  0x73   : > { %2838 = vmatprep.mubr.f32.mxu1 %v3682_v12  ;;  %2788 = vmatprep.mubr.f32.mxu0 %v565_v63  ;;  %v615_v63 = vand.u32 4294901760, %v614_v29  ;;  %v4507_v29 = vld [vmem:[#allocation35_spill] sm:$0xff] }
  0x74   : > { %2839 = vmatmul.mubr.f32.gmra.mxu1 %v3689_v52  ;;  %2789 = vmatmul.mubr.f32.gmra.mxu0 %v575_v23  ;;  %v1671_v23 = vmul.f32 %v3501_v57, %v3501_v57 }
  0x75   : > { %2864 = vmatpush3.xpose.msra.mxu0 %v3444_v36  ;;  %2916 = vmatpush3.xpose.msra.mxu1 %v3384_v13  ;;  %v1668_v36 = vmul.f32 %v3562_v53, %v3562_v53  ;;  %v1669_v53 = vmul.f32 %v3545_v32, %v3545_v32 }
  0x76   : > { %2865 = vmatprep.subr.mxu0 %v3469_v43  ;;  %2917 = vmatprep.subr.mxu1 %v3399_v18  ;;  %v1697_v57 = vsel %vm283_vm0, %v1671_v23, 0.0 }
  0x77   : > { %2841 = vmatprep.mubr.f32.mxu1 %v3706_v37  ;;  %2791 = vmatprep.mubr.f32.mxu0 %v585_v25  ;;  %v1691_v32 = vsel %vm283_vm0, %v1669_v53, 0.0  ;;  %v4505_v25 = vand.u32 4294901760, %v3506_v59  ;;  %v4512_v53 = vld [vmem:[#allocation29_spill] sm:$0xff] }
  0x78   : > { %2842 = vmatmul.mubr.f32.gmra.mxu1 %v3719_v2  ;;  %2792 = vmatmul.mubr.f32.gmra.mxu0 %v595_v11  ;;  %v1675_v11 = vmul.f32 %v4506_v6, %v4506_v6  ;;  %v4518_v6 = vld [vmem:[#allocation10_spill] sm:$0xff] }
  0x79   : > { %2866 = vmatpush3.xpose.msra.mxu0 %v3469_v43  ;;  %2918 = vmatpush3.xpose.msra.mxu1 %v3399_v18  ;;  %v1688_v43 = vsel %vm283_vm0, %v1668_v36, 0.0  ;;  %v4510_v36 = vld [vmem:[#allocation14_spill] sm:$0xff] }
  0x7a   : > { %2867 = vmatprep.subr.mxu0 %v3498_v56  ;;  %2919 = vmatprep.subr.mxu1 %v3424_v27 }
  0x7b   : > { %2844 = vmatprep.mubr.f32.mxu1 %v3738_v0  ;;  %2794 = vmatprep.mubr.f32.mxu0 %v605_v17 }
  0x7c   : > { %2845 = vmatmul.mubr.f32.gmra.mxu1 %v3743_v3  ;;  %2795 = vmatmul.mubr.f32.gmra.mxu0 %v615_v63  ;;  %v4509_v63 = vld [vmem:[#allocation21_spill] sm:$0xff] }
  0x7d   : > { %2868 = vmatpush3.xpose.msra.mxu0 %v3498_v56  ;;  %2920 = vmatpush3.xpose.msra.mxu1 %v3424_v27  ;;  %v1682_v56 = vsel %vm283_vm0, %v1666_v21, 0.0  ;;  %v1677_v21 = vmul.f32 %v4510_v36, %v4510_v36 }
  0x7e   : > { %2869 = vmatprep.subr.mxu0 %v3521_v4  ;;  %2921 = vmatprep.subr.mxu1 %v3441_v35 }
  0x7f   : > { %2847 = vmatprep.mubr.f32.mxu1 %v3761_v7  ;;  %2885 = vmatprep.mubr.f32.mxu0 %v3506_v59  ;;  %v4508_v59 = vld [vmem:[#allocation27_spill] sm:$0xff]  ;;  %v1715_v23 = vsel %vm283_vm0, %v1677_v21, 0.0 }
  0x80   : > { %2848 = vmatmul.mubr.f32.gmra.mxu1 %v3767_v34  ;;  %1689 = vadd.xlane.f32.xlu1 %v1688_v43  ;;  %v4511_v43 = vld [vmem:[#allocation38_spill] sm:$0xff]  ;;  %v4522_v21 = vld [vmem:[#allocation39_spill] sm:$0xff] }
  0x81   : > { %2870 = vmatpush3.xpose.msra.mxu0 %v3521_v4  ;;  %2922 = vmatpush3.xpose.msra.mxu1 %v3441_v35  ;;  %v1670_v4 = vmul.f32 %v3524_v5, %v3524_v5 }
  0x82   : > { %2871 = vmatprep.subr.mxu0 %v3536_v26  ;;  %2923 = vmatprep.subr.mxu1 %v3474_v46 }
  0x83   : > { %2850 = vmatprep.mubr.f32.mxu1 %v3781_v44  ;;  %1683 = vadd.xlane.f32.xlu0 %v1682_v56  ;;  %v1694_v5 = vsel %vm283_vm0, %v1670_v4, 0.0 }
  0x84   : > { %2851 = vmatmul.mubr.f32.gmra.mxu1 %v3791_v61  ;;  %1692 = vadd.xlane.f32.xlu1 %v1691_v32  ;;  %v1676_v32 = vmul.f32 %v4513_v58, %v4513_v58  ;;  %v4524_v58 = vld [vmem:[#allocation36_spill] sm:$0xff] }
  0x85   : > { %2872 = vmatpush3.xpose.msra.mxu0 %v3536_v26  ;;  %2924 = vmatpush3.xpose.msra.mxu1 %v3474_v46  ;;  %v1672_v26 = vmul.f32 %v3482_v49, %v3482_v49  ;;  %v1674_v49 = vmul.f32 %v4509_v63, %v4509_v63 }
  0x86   : > { %2873 = vmatprep.subr.mxu0 %v3559_v50  ;;  %2925 = vmatprep.subr.mxu1 %v3487_v51 }
  0x87   : > { %2941 = vmatprep.mubr.f32.mxu1 %v4505_v25  ;;  %1686 = vadd.xlane.f32.xlu0 %v1685_v28  ;;  %v1700_v17 = vsel %vm283_vm0, %v1672_v26, 0.0  ;;  %v1706_v56 = vsel %vm283_vm0, %v1674_v49, 0.0  ;;  %v4514_v28 = vld [vmem:[#allocation12_spill] sm:$0xff]  ;;  %v1712_v25 = vsel %vm283_vm0, %v1676_v32, 0.0  ;;  %v4521_v49 = vld [vmem:[#allocation11_spill] sm:$0xff] }
  0x88   : > { %1698 = vadd.xlane.f32.xlu1 %v1697_v57  ;;  %v1679_v4 = vmul.f32 %v4514_v28, %v4514_v28  ;;  %v4515_v57 = vld [vmem:[#allocation42_spill] sm:$0xff] }
  0x89   : > { %2874 = vmatpush3.xpose.msra.mxu0 %v3559_v50  ;;  %2926 = vmatpush3.xpose.msra.mxu1 %v3487_v51  ;;  %v1709_v50 = vsel %vm283_vm0, %v1675_v11, 0.0  ;;  %v1681_v11 = vmul.f32 %v4518_v6, %v4518_v6  ;;  %v4530_v6 = vld [vmem:[#allocation44_spill] sm:$0xff] }
  0x8a   : > { %2875 = vmatprep.subr.mxu0 %v4507_v29  ;;  %2927 = vmatprep.subr.mxu1 %v4508_v59 }
  0x8b   : > { %1695 = vadd.xlane.f32.xlu0 %v1694_v5  ;;  %v4517_v5 = vld [vmem:[#allocation13_spill] sm:$0xff]  ;;  %v1727_v36 = vsel %vm283_vm0, %v1681_v11, 0.0 }
  0x8c   : > { %1704 = vadd.xlane.f32.xlu1 %v1703_v41  ;;  %v1678_v26 = vmul.f32 %v4517_v5, %v4517_v5  ;;  %v1721_v41 = vsel %vm283_vm0, %v1679_v4, 0.0  ;;  %v4528_v5 = vld [vmem:[#allocation46_spill] sm:$0xff]  ;;  %v4531_v11 = vld [vmem:[#allocation17_spill] sm:$0xff] }
  0x8d   : > { %2876 = vmatpush3.xpose.msra.mxu0 %v4507_v29  ;;  %2928 = vmatpush3.xpose.msra.mxu1 %v4508_v59  ;;  %v4519_v29 = vld [vmem:[#allocation43_spill] sm:$0xff] }
  0x8e   : > { %2877 = vmatprep.subr.mxu0 %v4511_v43  ;;  %2929 = vmatprep.subr.mxu1 %v4512_v53  ;;  %v1718_v63 = vsel %vm283_vm0, %v1678_v26, 0.0 }
  0x8f   : > { %1701 = vadd.xlane.f32.xlu0 %v1700_v17  ;;  %v4520_v17 = vld [vmem:[#allocation33_spill] sm:$0xff] }
  0x90   : > { %1710 = vadd.xlane.f32.xlu1 %v1709_v50  ;;  %v1680_v50 = vmul.f32 %v4521_v49, %v4521_v49  ;;  %v4534_v49 = vld [vmem:[#allocation18_spill] sm:$0xff] }
  0x91   : > { %2878 = vmatpush3.xpose.msra.mxu0 %v4511_v43  ;;  %2930 = vmatpush3.xpose.msra.mxu1 %v4512_v53  ;;  %v1731_v43 = vmul.f32 %v4522_v21, %v4522_v21 }
  0x92   : > { %2879 = vmatprep.subr.mxu0 %v4515_v57  ;;  %2931 = vmatprep.subr.mxu1 %v4516_v60  ;;  %v1724_v32 = vsel %vm283_vm0, %v1680_v50, 0.0  ;;  %v4535_v50 = vld [vmem:[#allocation53_spill] sm:$0xff] }
  0x93   : > { %1707 = vadd.xlane.f32.xlu0 %v1706_v56  ;;  %v4523_v56 = vld [vmem:[#allocation48_spill] sm:$0xff]  ;;  %v1749_v4 = vsel %vm283_vm0, %v1731_v43, 0.0 }
  0x94   : > { %1716 = vadd.xlane.f32.xlu1 %v1715_v23  ;;  %v4525_v23 = vld [vmem:[#allocation24_spill] sm:$0xff] }
  0x95   : > { %2880 = vmatpush3.xpose.msra.mxu0 %v4515_v57  ;;  %2932 = vmatpush3.xpose.msra.mxu1 %v4516_v60  ;;  %v1730_v28 = vmul.f32 %v4525_v23, %v4525_v23  ;;  %v4526_v57 = vld [vmem:[#allocation40_spill] sm:$0xff]  ;;  %v4542_v23 = vand.u32 4294901760, %v4535_v50 }
  0x96   : > { %2881 = vmatprep.subr.mxu0 %v4519_v29  ;;  %2933 = vmatprep.subr.mxu1 %v4520_v17  ;;  %v4538_v43 = vld [vmem:[#allocation20_spill] sm:$0xff] }
  0x97   : > { %1713 = vadd.xlane.f32.xlu0 %v1712_v25  ;;  %v4527_v25 = vld [vmem:[#allocation16_spill] sm:$0xff]  ;;  %v1746_v26 = vsel %vm283_vm0, %v1730_v28, 0.0  ;;  %v4544_v28 = vld [vmem:[#allocation23_spill] sm:$0xff] }
  0x98   : > { %1722 = vadd.xlane.f32.xlu1 %v1721_v41  ;;  %v4529_v41 = vld [vmem:[#allocation49_spill] sm:$0xff] }
  0x99   : > { %2882 = vmatpush3.xpose.msra.mxu0 %v4519_v29  ;;  %2934 = vmatpush3.xpose.msra.mxu1 %v4520_v17  ;;  %v4532_v29 = vld [vmem:[#allocation50_spill] sm:$0xff]  ;;  %v4537_v21 = vand.u32 4294901760, %v4529_v41 }
  0x9a   : > { %2883 = vmatprep.subr.mxu0 %v4523_v56  ;;  %2935 = vmatprep.subr.mxu1 %v4524_v58 }
  0x9b   : > { %1719 = vadd.xlane.f32.xlu0 %v1718_v63  ;;  %v4533_v63 = vld [vmem:[#allocation52_spill] sm:$0xff] }
  0x9c   : > { %1728 = vadd.xlane.f32.xlu1 %v1727_v36  ;;  %v4536_v36 = vand.u32 4294901760, %v4528_v5 }
  0x9d   : > { %2884 = vmatpush3.xpose.msra.mxu0 %v4523_v56  ;;  %2936 = vmatpush3.xpose.msra.mxu1 %v4524_v58  ;;  %v4539_v56 = vand.u32 4294901760, %v4532_v29 }
  0x9e   : > { %2937 = vmatprep.subr.mxu1 %v4526_v57  ;;  %2965 = vmatprep.subr.mxu0 %v4527_v25 }
  0x9f   : > { %1725 = vadd.xlane.f32.xlu0 %v1724_v32  ;;  %v4541_v32 = vld [vmem:[#allocation22_spill] sm:$0xff] }
  0xa0   : > { %2886 = vmatmul.mubr.f32.vlgmr.msra.gmra.mxu0 %v4528_v5  ;;  %1750 = vadd.xlane.f32.xlu1 %v1749_v4  ;;  %v4545_v4 = vand.u32 4294901760, %v3714_v31 }
  0xa1   : > { %2938 = vmatpush3.xpose.msra.mxu1 %v4526_v57  ;;  %2966 = vmatpush3.xpose.msra.mxu0 %v4527_v25 }
  0xa2   : > { %2888 = vmatprep.mubr.f32.mxu0 %v4529_v41  ;;  %2939 = vmatprep.subr.mxu1 %v4530_v6 }
  0xa3   : > { %2967 = vmatprep.subr.mxu0 %v4531_v11  ;;  %1747 = vadd.xlane.f32.xlu0 %v1746_v26 }
  0xa4   : > { %2889 = vmatmul.mubr.f32.gmra.mxu0 %v4532_v29 }
  0xa5   : > { %2940 = vmatpush3.xpose.msra.mxu1 %v4530_v6  ;;  %2968 = vmatpush3.xpose.msra.mxu0 %v4531_v11 }
  0xa6   : > { %2891 = vmatprep.mubr.f32.mxu0 %v4533_v63  ;;  %2969 = vmatprep.subr.mxu0 %v4534_v49 }
  0xa7   : > { %3021 = vmatprep.subr.mxu1 %v3373_v8 }
  0xa8   : > { %2892 = vmatmul.mubr.f32.gmra.mxu0 %v4535_v50  ;;  %2942 = vmatmul.mubr.f32.vlgmr.msra.gmra.mxu1 %v4536_v36 }
  0xa9   : > { %2970 = vmatpush3.xpose.msra.mxu0 %v4534_v49  ;;  %3022 = vmatpush3.xpose.msra.mxu1 %v3373_v8  ;;  %v4540_v8 = vand.u32 4294901760, %v4533_v63 }
  0xaa   : > { %2894 = vmatprep.mubr.f32.mxu0 %v3704_v62  ;;  %2944 = vmatprep.mubr.f32.mxu1 %v4537_v21 }
  0xab   : > { %2971 = vmatprep.subr.mxu0 %v4538_v43  ;;  %3023 = vmatprep.subr.mxu1 %v3375_v9 }
  0xac   : > { %2895 = vmatmul.mubr.f32.gmra.mxu0 %v3714_v31  ;;  %2945 = vmatmul.mubr.f32.gmra.mxu1 %v4539_v56  ;;  %v4549_v31 = vand.u32 4294901760, %v3765_v24 }
  0xad   : > { %2972 = vmatpush3.xpose.msra.mxu0 %v4538_v43  ;;  %3024 = vmatpush3.xpose.msra.mxu1 %v3375_v9  ;;  %v4543_v9 = vand.u32 4294901760, %v3704_v62  ;;  %v4547_v62 = vand.u32 4294901760, %v3741_v19 }
  0xae   : > { %2897 = vmatprep.mubr.f32.mxu0 %v3731_v48  ;;  %2947 = vmatprep.mubr.f32.mxu1 %v4540_v8  ;;  %v4551_v48 = vld [vmem:[#allocation26_spill] sm:$0xff] }
  0xaf   : > { %2973 = vmatprep.subr.mxu0 %v4541_v32  ;;  %3025 = vmatprep.subr.mxu1 %v3377_v10 }
  0xb0   : > { %2898 = vmatmul.mubr.f32.gmra.mxu0 %v3741_v19  ;;  %2948 = vmatmul.mubr.f32.gmra.mxu1 %v4542_v23  ;;  %v4555_v19 = vld [vmem:[#allocation41_spill] sm:$0xff] }
  0xb1   : > { %2974 = vmatpush3.xpose.msra.mxu0 %v4541_v32  ;;  %3026 = vmatpush3.xpose.msra.mxu1 %v3377_v10  ;;  %v4546_v10 = vld [vmem:[#allocation25_spill] sm:$0xff] }
  0xb2   : > { %2900 = vmatprep.mubr.f32.mxu0 %v3759_v54  ;;  %2950 = vmatprep.mubr.f32.mxu1 %v4543_v9 }
  0xb3   : > { %2975 = vmatprep.subr.mxu0 %v4544_v28  ;;  %3027 = vmatprep.subr.mxu1 %v3384_v13 }
  0xb4   : > { %2901 = vmatmul.mubr.f32.gmra.mxu0 %v3765_v24  ;;  %2951 = vmatmul.mubr.f32.gmra.mxu1 %v4545_v4  ;;  %v4552_v24 = vld [vmem:[#allocation32_spill] sm:$0xff] }
  0xb5   : > { %2976 = vmatpush3.xpose.msra.mxu0 %v4544_v28  ;;  %3028 = vmatpush3.xpose.msra.mxu1 %v3384_v13  ;;  %v4548_v13 = vld [vmem:[#allocation28_spill] sm:$0xff] }
  0xb6   : > { %2903 = vmatprep.mubr.f32.mxu0 %v3779_v39  ;;  %2953 = vmatprep.mubr.f32.mxu1 %v543_v30  ;;  %v4558_v30 = vld [vmem:[#allocation51_spill] sm:$0xff] }
  0xb7   : > { %2977 = vmatprep.subr.mxu0 %v4546_v10  ;;  %3029 = vmatprep.subr.mxu1 %v3399_v18 }
  0xb8   : > { %2904 = vmatmul.mubr.f32.gmra.mxu0 %v3789_v42  ;;  %2954 = vmatmul.mubr.f32.gmra.mxu1 %v4547_v62 }
  0xb9   : > { %2978 = vmatpush3.xpose.msra.mxu0 %v4546_v10  ;;  %3030 = vmatpush3.xpose.msra.mxu1 %v3399_v18  ;;  %v4550_v18 = vld [vmem:[#allocation30_spill] sm:$0xff] }
  0xba   : > { %2906 = vmatprep.mubr.f32.mxu0 %v3803_v15  ;;  %2956 = vmatprep.mubr.f32.mxu1 %v563_v47 }
  0xbb   : > { %2979 = vmatprep.subr.mxu0 %v4548_v13  ;;  %3031 = vmatprep.subr.mxu1 %v3424_v27 }
  0xbc   : > { %2907 = vmatmul.mubr.f32.gmra.mxu0 %v3811_v14  ;;  %2957 = vmatmul.mubr.f32.gmra.mxu1 %v4549_v31 }
  0xbd   : > { %2980 = vmatpush3.xpose.msra.mxu0 %v4548_v13  ;;  %3032 = vmatpush3.xpose.msra.mxu1 %v3424_v27  ;;  %v4553_v27 = vld [vmem:[#allocation34_spill] sm:$0xff] }
  0xbe   : > { %2959 = vmatprep.mubr.f32.mxu1 %v583_v22  ;;  %2981 = vmatprep.subr.mxu0 %v4550_v18 }
  0xbf   : > { %3033 = vmatprep.subr.mxu1 %v3441_v35  ;;  %2997 = vmatprep.mubr.f32.mxu0 %v4551_v48 }
  0xc0   : > { %2960 = vmatmul.mubr.f32.gmra.mxu1 %v593_v38 }
  0xc1   : > { %2982 = vmatpush3.xpose.msra.mxu0 %v4550_v18  ;;  %3034 = vmatpush3.xpose.msra.mxu1 %v3441_v35  ;;  %v4554_v35 = vld [vmem:[#allocation37_spill] sm:$0xff] }
  0xc2   : > { %2962 = vmatprep.mubr.f32.mxu1 %v603_v16  ;;  %2983 = vmatprep.subr.mxu0 %v4552_v24 }
  0xc3   : > { %3035 = vmatprep.subr.mxu1 %v3474_v46 }
  0xc4   : > { %2963 = vmatmul.mubr.f32.gmra.mxu1 %v613_v20 }
  0xc5   : > { %2984 = vmatpush3.xpose.msra.mxu0 %v4552_v24  ;;  %3036 = vmatpush3.xpose.msra.mxu1 %v3474_v46  ;;  %v4556_v46 = vld [vmem:[#allocation45_spill] sm:$0xff]  ;;  %v1810_v24 = vlaneseq }
  0xc6   : > { %2985 = vmatprep.subr.mxu0 %v4553_v27  ;;  %3037 = vmatprep.subr.mxu1 %v3487_v51 }
  0xc7   : > { %3053 = vmatprep.mubr.f32.mxu1 %v4551_v48 }
  0xc9   : > { %2986 = vmatpush3.xpose.msra.mxu0 %v4553_v27  ;;  %3038 = vmatpush3.xpose.msra.mxu1 %v3487_v51  ;;  %v4557_v51 = vld [vmem:[#allocation47_spill] sm:$0xff] }
  0xca   : > { %2987 = vmatprep.subr.mxu0 %v4554_v35  ;;  %3039 = vmatprep.subr.mxu1 %v4508_v59 }
  0xcd   : > { %2988 = vmatpush3.xpose.msra.mxu0 %v4554_v35  ;;  %3040 = vmatpush3.xpose.msra.mxu1 %v4508_v59 }
  0xce   : > { %2989 = vmatprep.subr.mxu0 %v4555_v19  ;;  %3041 = vmatprep.subr.mxu1 %v4512_v53 }
  0xd1   : > { %2990 = vmatpush3.xpose.msra.mxu0 %v4555_v19  ;;  %3042 = vmatpush3.xpose.msra.mxu1 %v4512_v53 }
  0xd2   : > { %2991 = vmatprep.subr.mxu0 %v4556_v46  ;;  %3043 = vmatprep.subr.mxu1 %v4516_v60 }
  0xd5   : > { %2992 = vmatpush3.xpose.msra.mxu0 %v4556_v46  ;;  %3044 = vmatpush3.xpose.msra.mxu1 %v4516_v60 }
  0xd6   : > { %2993 = vmatprep.subr.mxu0 %v4557_v51  ;;  %3045 = vmatprep.subr.mxu1 %v4520_v17 }
  0xd9   : > { %2994 = vmatpush3.xpose.msra.mxu0 %v4557_v51  ;;  %3046 = vmatpush3.xpose.msra.mxu1 %v4520_v17 }
  0xda   : > { %2995 = vmatprep.subr.mxu0 %v4558_v30  ;;  %3047 = vmatprep.subr.mxu1 %v4524_v58 }
  0xdd   : > { %2996 = vmatpush3.xpose.msra.mxu0 %v4558_v30  ;;  %3048 = vmatpush3.xpose.msra.mxu1 %v4524_v58 }
  0xde   : > { %3049 = vmatprep.subr.mxu1 %v4526_v57 }
  0xe0   : > { %2998 = vmatmul.mubr.f32.vlgmr.msra.gmra.mxu0 %v3619_v33 }
  0xe1   : > { %3050 = vmatpush3.xpose.msra.mxu1 %v4526_v57  ;;  %3000 = vmatprep.mubr.f32.mxu0 %v3637_v45 }
  0xe2   : > { %3051 = vmatprep.subr.mxu1 %v4530_v6 }
  0xe4   : > { %3001 = vmatmul.mubr.f32.gmra.mxu0 %v3643_v1 }
  0xe5   : > { %3052 = vmatpush3.xpose.msra.mxu1 %v4530_v6  ;;  %3003 = vmatprep.mubr.f32.mxu0 %v3658_v55 }
  0xe8   : > { %3004 = vmatmul.mubr.f32.gmra.mxu0 %v3663_v40  ;;  %3054 = vmatmul.mubr.f32.vlgmr.msra.gmra.mxu1 %v3619_v33 }
  0xe9   : > { %3006 = vmatprep.mubr.f32.mxu0 %v3682_v12  ;;  %3056 = vmatprep.mubr.f32.mxu1 %v3637_v45 }
  0xec   : > { %3007 = vmatmul.mubr.f32.gmra.mxu0 %v3689_v52  ;;  %3057 = vmatmul.mubr.f32.gmra.mxu1 %v3643_v1 }
  0xed   : > { %3009 = vmatprep.mubr.f32.mxu0 %v3706_v37  ;;  %3059 = vmatprep.mubr.f32.mxu1 %v3658_v55 }
  0xf0   : > { %3010 = vmatmul.mubr.f32.gmra.mxu0 %v3719_v2  ;;  %3060 = vmatmul.mubr.f32.gmra.mxu1 %v3663_v40 }
  0xf1   : > { %3012 = vmatprep.mubr.f32.mxu0 %v3738_v0  ;;  %3062 = vmatprep.mubr.f32.mxu1 %v3682_v12 }
  0xf4   : > { %3013 = vmatmul.mubr.f32.gmra.mxu0 %v3743_v3  ;;  %3063 = vmatmul.mubr.f32.gmra.mxu1 %v3689_v52 }
  0xf5   : > { %3015 = vmatprep.mubr.f32.mxu0 %v3761_v7  ;;  %3065 = vmatprep.mubr.f32.mxu1 %v3706_v37 }
  0xf8   : > { %3016 = vmatmul.mubr.f32.gmra.mxu0 %v3767_v34  ;;  %3066 = vmatmul.mubr.f32.gmra.mxu1 %v3719_v2 }
  0xf9   : > { %3018 = vmatprep.mubr.f32.mxu0 %v3781_v44  ;;  %3068 = vmatprep.mubr.f32.mxu1 %v3738_v0 }
  0xfc   : > { %3019 = vmatmul.mubr.f32.gmra.mxu0 %v3791_v61  ;;  %3069 = vmatmul.mubr.f32.gmra.mxu1 %v3743_v3 }
  0xfd   : > { %3071 = vmatprep.mubr.f32.mxu1 %v3761_v7 }
 0x100   : > { %3072 = vmatmul.mubr.f32.gmra.mxu1 %v3767_v34 }
 0x101   : > { %3074 = vmatprep.mubr.f32.mxu1 %v3781_v44 }
 0x104   : > { %3075 = vmatmul.mubr.f32.gmra.mxu1 %v3791_v61 }
 0x120   : > { %v4091_v1 = vpop.f32.mrf.mxu0 }
 0x122   : > { %v4093_v12 = vpop.f32.mrf.mxu0 }
 0x124   : > { %v2778_v33 = vpop.f32.mrf.mxu0 }
 0x126   : > { %v487_v52 = vpop.f32.mrf.mxu0 }
 0x128   : > { %v4095_v45 = vpop.f32.mrf.mxu1  ;;  %v2781_v55 = vpop.f32.mrf.mxu0 }
 0x12a   : > { %v4097_v40 = vpop.f32.mrf.mxu1  ;;  %v507_v37 = vpop.f32.mrf.mxu0 }
 0x12c   : > { %v2834_v2 = vpop.f32.mrf.mxu1  ;;  %v2784_v3 = vpop.f32.mrf.mxu0 }
 0x12d   : > { %v787_v0 = vadd.f32 %v2834_v2, %v2778_v33 }
 0x12e   : > { %v780_v54 = vpop.f32.mrf.mxu1  ;;  %v527_v7 = vpop.f32.mrf.mxu0 }
 0x12f   : > { %v781_v34 = vadd.f32 %v780_v54, %v487_v52  ;;  %v4113_v52 = vand.u32 127, %v1810_v24 }
 0x130   : > { %v2837_v47 = vpop.f32.mrf.mxu1  ;;  %v2787_v39 = vpop.f32.mrf.mxu0 }
 0x131   : > { %v799_v44 = vadd.f32 %v2837_v47, %v2781_v55  ;;  %v4119_v47 = vshrl.u32 %v1810_v24, 7 }
 0x132   : > { %v792_v20 = vpop.f32.mrf.mxu1  ;;  %v547_v42 = vpop.f32.mrf.mxu0 }
 0x133   : > { %v793_v61 = vadd.f32 %v792_v20, %v507_v37 }
 0x134   : > { %v2840_v22 = vpop.f32.mrf.mxu1  ;;  %v2790_v15 = vpop.f32.mrf.mxu0 }
 0x135   : > { %v811_v38 = vadd.f32 %v2840_v22, %v2784_v3 }
 0x136   : > { %v804_v14 = vpop.f32.mrf.mxu1  ;;  %v567_v16 = vpop.f32.mrf.mxu0 }
 0x137   : > { %v805_v59 = vadd.f32 %v804_v14, %v527_v7  ;;  %v1823_v14 = vadd.s32 4294967280, %v4113_v52 }
 0x138   : > { %v2843_v53 = vpop.f32.mrf.mxu1  ;;  %v2793_v58 = vpop.f32.mrf.mxu0 }
 0x139   : > { %v823_v60 = vadd.f32 %v2843_v53, %v2787_v39  ;;  %v1816_v39 = vadd.s32 4294967288, %v4113_v52  ;;  %v1814_v53 = vsub.s32 %v4113_v52, %v4119_v47 }
 0x13a   : > { %v816_v17 = vpop.f32.mrf.mxu1  ;;  %v587_v26 = vpop.f32.mrf.mxu0 }
 0x13b   : > { %v817_v57 = vadd.f32 %v816_v17, %v547_v42  ;;  %v1684_v42 = vpop.xlane.xlu0 %1683 }
 0x13c   : > { %v2846_v25 = vpop.f32.mrf.mxu1  ;;  %v2796_v63 = vpop.f32.mrf.mxu0 }
 0x13d   : > { %v835_v5 = vadd.f32 %v2846_v25, %v2790_v15 }
 0x13e   : > { %v828_v41 = vpop.f32.mrf.mxu1  ;;  %v607_v43 = vpop.f32.mrf.mxu0 }
 0x13f   : > { %v829_v6 = vadd.f32 %v828_v41, %v567_v16  ;;  %v1830_v41 = vadd.s32 4294967272, %v4113_v52 }
 0x140   : > { %v2849_v11 = vpop.f32.mrf.mxu1 }
 0x141   : > { %v847_v29 = vadd.f32 %v2849_v11, %v2793_v58 }
 0x142   : > { %v840_v49 = vpop.f32.mrf.mxu1 }
 0x143   : > { %v841_v50 = vadd.f32 %v840_v49, %v587_v26  ;;  %v1687_v49 = vpop.xlane.xlu0 %1686 }
 0x144   : > { %v2852_v36 = vpop.f32.mrf.mxu1 }
 0x145   : > { %v4099_v21 = vadd.f32 %v2852_v36, %v2796_v63  ;;  %v1826_v63 = vsub.s32 %v1823_v14, %v4119_v47  ;;  %v1858_v14 = vadd.s32 4294967240, %v4113_v52 }
 0x146   : > { %v852_v56 = vpop.f32.mrf.mxu1 }
 0x147   : > { %v4101_v8 = vadd.f32 %v852_v56, %v607_v43  ;;  %v1815_v56 = vrot.slane %v1684_v42, %v1814_v53 }
 0x160   : > { %v4103_v32 = vpop.f32.mrf.mxu0 }
 0x162   : > { %v4105_v23 = vpop.f32.mrf.mxu0 }
 0x164   : > { %v2890_v9 = vpop.f32.mrf.mxu0 }
 0x165   : > { %v984_v28 = vadd.f32 %v2890_v9, %v787_v0 }
 0x166   : > { %v976_v4 = vpop.f32.mrf.mxu0 }
 0x167   : > { %v977_v10 = vadd.f32 %v976_v4, %v781_v34 }
 0x168   : > { %v2893_v62 = vpop.f32.mrf.mxu0  ;;  %v4107_v13 = vpop.f32.mrf.mxu1 }
 0x169   : > { %v998_v31 = vadd.f32 %v2893_v62, %v799_v44 }
 0x16a   : > { %v990_v18 = vpop.f32.mrf.mxu0  ;;  %v4109_v48 = vpop.f32.mrf.mxu1 }
 0x16b   : > { %v991_v27 = vadd.f32 %v990_v18, %v793_v61 }
 0x16c   : > { %v2896_v35 = vpop.f32.mrf.mxu0  ;;  %v2946_v19 = vpop.f32.mrf.mxu1 }
 0x16d   : > { %v1012_v46 = vadd.f32 %v2896_v35, %v811_v38  ;;  %v4111_v51 = vadd.f32 %v2946_v19, %v984_v28 }
 0x16e   : > { %v1004_v30 = vpop.f32.mrf.mxu0  ;;  %v1172_v33 = vpop.f32.mrf.mxu1 }
 0x16f   : > { %v1005_v55 = vadd.f32 %v1004_v30, %v805_v59  ;;  %v4115_v37 = vadd.f32 %v1172_v33, %v977_v10 }
 0x170   : > { %v2899_v2 = vpop.f32.mrf.mxu0  ;;  %v2949_v3 = vpop.f32.mrf.mxu1 }
 0x171   : > { %v1026_v0 = vadd.f32 %v2899_v2, %v823_v60  ;;  %v4117_v54 = vadd.f32 %v2949_v3, %v998_v31  ;;  %v1819_v60 = vsub.s32 %v1816_v39, %v4119_v47  ;;  %v1833_v31 = vsub.s32 %v1830_v41, %v4119_v47 }
 0x172   : > { %v1018_v7 = vpop.f32.mrf.mxu0  ;;  %v1188_v34 = vpop.f32.mrf.mxu1  ;;  %v1861_v41 = vsub.s32 %v1858_v14, %v4119_v47 }
 0x173   : > { %v1019_v44 = vadd.f32 %v1018_v7, %v817_v57  ;;  %v4122_v20 = vadd.f32 %v1188_v34, %v991_v27  ;;  %v1690_v57 = vpop.xlane.xlu1 %1689  ;;  %v1820_v9 = vrot.slane %v1687_v49, %v1819_v60  ;;  %v1851_v34 = vadd.s32 4294967248, %v4113_v52 }
 0x174   : > { %v2902_v61 = vpop.f32.mrf.mxu0  ;;  %v2952_v22 = vpop.f32.mrf.mxu1 }
 0x175   : > { %v1040_v15 = vadd.f32 %v2902_v61, %v835_v5  ;;  %v4124_v38 = vadd.f32 %v2952_v22, %v1012_v46  ;;  %v1822_v46 = vsel %vm1821_vm1, %v1820_v9, %v1815_v56  ;;  %vm2036_vm1 = vcmp.lt.s32.totalorder %v4113_v52, 16 }
 0x176   : > { %v1032_v16 = vpop.f32.mrf.mxu0  ;;  %v1204_v59 = vpop.f32.mrf.mxu1 }
 0x177   : > { %v1033_v17 = vadd.f32 %v1032_v16, %v829_v6  ;;  %v4130_v58 = vadd.f32 %v1204_v59, %v1005_v55  ;;  %v1837_v6 = vadd.s32 4294967264, %v4113_v52  ;;  %v1693_v27 = vpop.xlane.xlu1 %1692  ;;  %v1854_v59 = vsub.s32 %v1851_v34, %v4119_v47 }
 0x178   : > { %v2905_v25 = vpop.f32.mrf.mxu0  ;;  %v2955_v26 = vpop.f32.mrf.mxu1  ;;  %v1834_v2 = vrot.slane %v1693_v27, %v1833_v31 }
 0x179   : > { %v1054_v5 = vadd.f32 %v2905_v25, %v847_v29  ;;  %v4133_v11 = vadd.f32 %v2955_v26, %v1026_v0  ;;  %v1827_v29 = vrot.slane %v1690_v57, %v1826_v63  ;;  %v1840_v55 = vsub.s32 %v1837_v6, %v4119_v47  ;;  %v1696_v0 = vpop.xlane.xlu0 %1695 }
 0x17a   : > { %v1046_v36 = vpop.f32.mrf.mxu0  ;;  %v1220_v43 = vpop.f32.mrf.mxu1  ;;  %v1865_v26 = vadd.s32 4294967232, %v4113_v52  ;;  %v1879_v6 = vadd.s32 4294967216, %v4113_v52 }
 0x17b   : > { %v1047_v28 = vadd.f32 %v1046_v36, %v841_v50  ;;  %v4136_v4 = vadd.f32 %v1220_v43, %v1019_v44  ;;  %v1844_v50 = vadd.s32 4294967256, %v4113_v52  ;;  %v1829_v7 = vsel %vm1828_vm2, %v1827_v29, %v1822_v46  ;;  %v1699_v61 = vpop.xlane.xlu1 %1698 }
 0x17c   : > { %v2908_v10 = vpop.f32.mrf.mxu0  ;;  %v2958_v62 = vpop.f32.mrf.mxu1  ;;  %v1836_v22 = vsel %vm1835_vm3, %v1834_v2, %v1829_v7  ;;  %v1872_v36 = vadd.s32 4294967224, %v4113_v52  ;;  %v1868_v43 = vsub.s32 %v1865_v26, %v4119_v47  ;;  %v1882_v27 = vsub.s32 %v1879_v6, %v4119_v47 }
 0x17d   : > { %v1068_v18 = vadd.f32 %v2908_v10, %v4099_v21  ;;  %v4141_v24 = vadd.f32 %v2958_v62, %v1040_v15  ;;  %v1847_v44 = vsub.s32 %v1844_v50, %v4119_v47  ;;  %v1893_v50 = vadd.s32 4294967200, %v4113_v52 }
 0x17e   : > { %v1060_v35 = vpop.f32.mrf.mxu0  ;;  %v1236_v19 = vpop.f32.mrf.mxu1  ;;  %v1875_v10 = vsub.s32 %v1872_v36, %v4119_v47  ;;  %vm2356_vm2 = vcmask 1040384  }
 0x17f   : > { %v1061_v30 = vadd.f32 %v1060_v35, %v4101_v8  ;;  %v4145_v33 = vadd.f32 %v1236_v19, %v1033_v17  ;;  %v1841_v8 = vrot.slane %v1696_v0, %v1840_v55  ;;  %v1848_v53 = vrot.slane %v1699_v61, %v1847_v44  ;;  %v1702_v17 = vpop.xlane.xlu0 %1701 }
 0x180   : > { %v2961_v3 = vpop.f32.mrf.mxu1  ;;  %v1855_v63 = vrot.slane %v1702_v17, %v1854_v59  ;;  %v1900_v0 = vadd.s32 4294967192, %v4113_v52  ;;  %v1896_v7 = vsub.s32 %v1893_v50, %v4119_v47  ;;  %v1907_v61 = vadd.s32 4294967184, %v4113_v52  ;;  %v3141_v50 = vld [vmem:[%s3462_s6 + $0x18] sm:$0xff] }
 0x181   : > { %v4148_v21 = vadd.f32 %v2961_v3, %v1054_v5  ;;  %v1843_v57 = vsel %vm1842_vm4, %v1841_v8, %v1836_v22  ;;  %v1705_v5 = vpop.xlane.xlu1 %1704  ;;  %v1914_v59 = vadd.s32 4294967176, %v4113_v52 }
 0x182   : > { %v1252_v39 = vpop.f32.mrf.mxu1  ;;  %v1850_v49 = vsel %vm1849_vm5, %v1848_v53, %v1843_v57  ;;  %v1862_v56 = vrot.slane %v1705_v5, %v1861_v41  ;;  %v1903_v8 = vsub.s32 %v1900_v0, %v4119_v47  ;;  %v1910_v53 = vsub.s32 %v1907_v61, %v4119_v47  ;;  %v3142_v0 = vld [vmem:[%s3462_s6 + $0x10] sm:$0xff] }
 0x183   : > { %v4152_v42 = vadd.f32 %v1252_v39, %v1047_v28  ;;  %v1708_v9 = vpop.xlane.xlu0 %1707  ;;  %v1857_v28 = vsel %vm1856_vm6, %v1855_v63, %v1850_v49  ;;  %v1917_v26 = vsub.s32 %v1914_v59, %v4119_v47  ;;  %v775_v41 = vadd.f32 %v4095_v45, %v4091_v1 }
 0x184   : > { %v2964_v15 = vpop.f32.mrf.mxu1  ;;  %v1869_v31 = vrot.slane %v1708_v9, %v1868_v43  ;;  %v1864_v29 = vsel %vm1863_vm7, %v1862_v56, %v1857_v28  ;;  %v769_v43 = vadd.f32 %v4097_v40, %v4093_v12 }
 0x185   : > { %v4155_v16 = vadd.f32 %v2964_v15, %v1068_v18  ;;  %v1711_v62 = vpop.xlane.xlu1 %1710  ;;  %v1886_v18 = vadd.s32 4294967208, %v4113_v52  ;;  %v970_v56 = vadd.f32 %v4103_v32, %v775_v41 }
 0x186   : > { %v1268_v60 = vpop.f32.mrf.mxu1  ;;  %v1876_v35 = vrot.slane %v1711_v62, %v1875_v10  ;;  %v1871_v46 = vsel %vm1870_vm8, %v1869_v31, %v1864_v29  ;;  %v963_v28 = vadd.f32 %v4105_v23, %v769_v43 }
 0x187   : > { %v4158_v25 = vadd.f32 %v1268_v60, %v1061_v30  ;;  %v1714_v19 = vpop.xlane.xlu0 %1713  ;;  %v1889_v30 = vsub.s32 %v1886_v18, %v4119_v47  ;;  %v1165_v6 = vadd.f32 %v4107_v13, %v970_v56 }
 0x188   : > { %v1883_v2 = vrot.slane %v1714_v19, %v1882_v27  ;;  %v1878_v3 = vsel %vm1877_vm9, %v1876_v35, %v1871_v46  ;;  %v1157_v1 = vadd.f32 %v4109_v48, %v963_v28 }
 0x189   : > { %v1717_v55 = vpop.xlane.xlu1 %1716 }
 0x18a   : > { %v1890_v34 = vrot.slane %v1717_v55, %v1889_v30  ;;  %v1885_v44 = vsel %vm1884_vm10, %v1883_v2, %v1878_v3  ;;  %v1733_v30 = vmul.f32 %v3141_v50, %v3141_v50 }
 0x18b   : > { %v1720_v39 = vpop.xlane.xlu0 %1719 }
 0x18c   : > { %v1897_v15 = vrot.slane %v1720_v39, %v1896_v7  ;;  %v1892_v14 = vsel %vm1891_vm11, %v1890_v34, %v1885_v44  ;;  %v1732_v7 = vmul.f32 %v3142_v0, %v3142_v0  ;;  %v1755_v34 = vsel %vm283_vm0, %v1733_v30, 0.0  ;;  %v3143_v39 = vld [vmem:[%s3462_s6 + $0x28] sm:$0xff] }
 0x18d   : > { %v1723_v22 = vpop.xlane.xlu1 %1722  ;;  %v1735_v44 = vmul.f32 %v3143_v39, %v3143_v39 }
 0x18e   : > { %v1904_v60 = vrot.slane %v1723_v22, %v1903_v8  ;;  %v1899_v57 = vsel %vm1898_vm12, %v1897_v15, %v1892_v14  ;;  %v1752_v15 = vsel %vm283_vm0, %v1732_v7, 0.0  ;;  %v3144_v14 = vld [vmem:[%s3462_s6 + $0x20] sm:$0xff] }
 0x18f   : > { %v1726_v17 = vpop.xlane.xlu0 %1725  ;;  %v1734_v59 = vmul.f32 %v3144_v14, %v3144_v14 }
 0x190   : > { %v1911_v63 = vrot.slane %v1726_v17, %v1910_v53  ;;  %v1906_v49 = vsel %vm1905_vm13, %v1904_v60, %v1899_v57  ;;  %v1761_v53 = vsel %vm283_vm0, %v1735_v44, 0.0  ;;  %v3145_v60 = vld [vmem:[%s3462_s6 + $0x38] sm:$0xff] }
 0x191   : > { %v1729_v5 = vpop.xlane.xlu1 %1728  ;;  %v1737_v17 = vmul.f32 %v3145_v60, %v3145_v60  ;;  %v1758_v41 = vsel %vm283_vm0, %v1734_v59, 0.0 }
 0x192   : > { %v1918_v9 = vrot.slane %v1729_v5, %v1917_v26  ;;  %v1913_v47 = vsel %vm1912_vm14, %v1911_v63, %v1906_v49  ;;  %v3146_v5 = vld [vmem:[%s3462_s6 + $0x30] sm:$0xff] }
 0x193   : > { %v1748_v23 = vpop.xlane.xlu0 %1747  ;;  %v1736_v63 = vmul.f32 %v3146_v5, %v3146_v5  ;;  %v1767_v49 = vsel %vm283_vm0, %v1737_v17, 0.0 }
 0x194   : > { %v4185_v62 = vsel %vm1919_vm15, %v1918_v9, %v1913_v47 }
 0x195   : > { %v1751_v31 = vpop.xlane.xlu1 %1750  ;;  %v1934_v48 = vadd.f32 %v4185_v62, %v1748_v23  ;;  %v1764_v28 = vsel %vm283_vm0, %v1736_v63, 0.0  ;;  %v3151_v23 = vld [vmem:[%s3462_s6 + $0x68] sm:$0xff] }
 0x196   : > { %v1935_v32 = vadd.f32 %v4185_v62, %v1751_v31 }
 0x1a0   : > { %v2999_v36 = vpop.f32.mrf.mxu0 }
 0x1a1   : > { %v1402_v45 = vadd.f32 %v2999_v36, %v1165_v6  ;;  %v3147_v36 = vld [vmem:[%s3462_s6 + $0x48] sm:$0xff]  ;;  %v3148_v6 = vld [vmem:[%s3462_s6 + $0x40] sm:$0xff] }
 0x1a2   : > { %v1395_v10 = vpop.f32.mrf.mxu0  ;;  %v1739_v43 = vmul.f32 %v3147_v36, %v3147_v36  ;;  %v1738_v47 = vmul.f32 %v3148_v6, %v3148_v6 }
 0x1a3   : > { %v1396_v18 = vadd.f32 %v1395_v10, %v1157_v1  ;;  %v3149_v1 = vld [vmem:[%s3462_s6 + $0x58] sm:$0xff] }
 0x1a4   : > { %v1773_v10 = vsel %vm283_vm0, %v1739_v43, 0.0  ;;  %v3002_v39 = vpop.f32.mrf.mxu0 }
 0x1a5   : > { %v1414_v5 = vadd.f32 %v3002_v39, %v4111_v51 }
 0x1a8   : > { %v3055_v29 = vpop.f32.mrf.mxu1 }
 0x1a9   : > { %v1579_v12 = vadd.f32 %v3055_v29, %v1402_v45  ;;  %v1741_v45 = vmul.f32 %v3149_v1, %v3149_v1 }
 0x1aa   : > { %v1572_v40 = vpop.f32.mrf.mxu1 }
 0x1ab   : > { %v1951_v27 = vmul.f32 2.0, %v1579_v12  ;;  %v1573_v13 = vadd.f32 %v1572_v40, %v1396_v18  ;;  %v1770_v18 = vsel %vm283_vm0, %v1738_v47, 0.0  ;;  %v3150_v12 = vld [vmem:[%s3462_s6 + $0x50] sm:$0xff] }
 0x1ac   : > { %v1740_v40 = vmul.f32 %v3150_v12, %v3150_v12  ;;  %v3058_v44 = vpop.f32.mrf.mxu1 }
 0x1ad   : > { %v1950_v35 = vmul.f32 2.0, %v1573_v13  ;;  %v1967_v19 = vsub.f32 %v1935_v32, %v1951_v27  ;;  %v1779_v32 = vsel %vm283_vm0, %v1741_v45, 0.0  ;;  %v1743_v27 = vmul.f32 %v3151_v23, %v3151_v23 }
 0x1ae   : > { %v1776_v13 = vsel %vm283_vm0, %v1740_v40, 0.0  ;;  %v1591_v36 = vadd.f32 %v3058_v44, %v1414_v5 }
 0x1af   : > { %v1983_v46 = vmax.f32 %v1967_v19, 0.0  ;;  %v1966_v55 = vsub.f32 %v1934_v48, %v1950_v35  ;;  %v3152_v35 = vld [vmem:[%s3462_s6 + $0x60] sm:$0xff]  ;;  %v1785_v48 = vsel %vm283_vm0, %v1743_v27, 0.0 }
 0x1b0   : > { %v1742_v19 = vmul.f32 %v3152_v35, %v3152_v35  ;;  %v1953_v45 = vmul.f32 2.0, %v1591_v36 }
 0x1b1   : > { %v2056_v2 = vsel %vm2036_vm1, %v1983_v46, inf  ;;  %v1982_v3 = vmax.f32 %v1966_v55, 0.0  ;;  %v3154_v55 = vld [vmem:[%s3462_s6 + $0x70] sm:$0xff] }
 0x1b2   : > { %2073 = vmin.xlane.f32.xlu1 %v2056_v2  ;;  %v1782_v30 = vsel %vm283_vm0, %v1742_v19, 0.0  ;;  %v1744_v2 = vmul.f32 %v3154_v55, %v3154_v55 }
 0x1b3   : > { %v2055_v61 = vsel %vm2036_vm1, %v1982_v3, inf  ;;  %v2237_v8 = vmin.f32 %v1982_v3, %v1983_v46  ;;  %v3153_v46 = vld [vmem:[%s3462_s6 + $0x78] sm:$0xff]  ;;  %s2371_s6 = scalar_lea.sflag [#allocation5], %s4285_s7 }
 0x1b4   : > { %2071 = vmin.xlane.f32.xlu0 %v2055_v61  ;;  %v1745_v50 = vmul.f32 %v3153_v46, %v3153_v46  ;;  %v1788_v0 = vsel %vm283_vm0, %v1744_v2, 0.0  ;;  %v1407_v61 = vpop.f32.mrf.mxu0 }
 0x1b5   : > { %v2240_v22 = vrot.slane %v2237_v8, 4 }
 0x1b6   : > { %1756 = vadd.xlane.f32.xlu1 %v1755_v34  ;;  %v1791_v3 = vsel %vm283_vm0, %v1745_v50, 0.0  ;;  %vm2107_vm0 = vcmask 7168  }
 0x1b7   : > { %v2241_v57 = vmin.f32 %v2237_v8, %v2240_v22  ;;  %v1584_v8 = vpop.f32.mrf.mxu1  ;;  %v3005_v22 = vpop.f32.mrf.mxu0 }
 0x1b8   : > { %1753 = vadd.xlane.f32.xlu0 %v1752_v15 }
 0x1b9   : > { %v2242_v26 = vrot.slane %v2241_v57, 2  ;;  %v3061_v15 = vpop.f32.mrf.mxu1  ;;  %v1419_v14 = vpop.f32.mrf.mxu0 }
 0x1ba   : > { %1762 = vadd.xlane.f32.xlu1 %v1761_v53  ;;  %v1420_v47 = vadd.f32 %v1419_v14, %v4122_v20 }
 0x1bb   : > { %v2243_v56 = vmin.f32 %v2241_v57, %v2242_v26  ;;  %v1596_v59 = vpop.f32.mrf.mxu1  ;;  %v3008_v53 = vpop.f32.mrf.mxu0 }
 0x1bc   : > { %1759 = vadd.xlane.f32.xlu0 %v1758_v41  ;;  %v1438_v51 = vadd.f32 %v3008_v53, %v4124_v38  ;;  %v1597_v12 = vadd.f32 %v1596_v59, %v1420_v47 }
 0x1bd   : > { %v2244_v9 = vrot.slane %v2243_v56, 1  ;;  %v3064_v60 = vpop.f32.mrf.mxu1  ;;  %v1431_v17 = vpop.f32.mrf.mxu0 }
 0x1be   : > { %1768 = vadd.xlane.f32.xlu1 %v1767_v49  ;;  %v1615_v40 = vadd.f32 %v3064_v60, %v1438_v51  ;;  %v1432_v46 = vadd.f32 %v1431_v17, %v4130_v58  ;;  %v1954_v55 = vmul.f32 2.0, %v1597_v12 }
 0x1bf   : > { %v2245_v31 = vmin.f32 %v2243_v56, %v2244_v9  ;;  %v1608_v57 = vpop.f32.mrf.mxu1  ;;  %v3011_v26 = vpop.f32.mrf.mxu0  ;;  %v1408_v56 = vadd.f32 %v1407_v61, %v4115_v37  ;;  %v1426_v9 = vadd.f32 %v3005_v22, %v4117_v54 }
 0x1c0   : > { %1765 = vadd.xlane.f32.xlu0 %v1764_v28  ;;  %v1450_v50 = vadd.f32 %v3011_v26, %v4133_v11  ;;  %v1957_v2 = vmul.f32 2.0, %v1615_v40  ;;  %v1609_v44 = vadd.f32 %v1608_v57, %v1432_v46 }
 0x1c1   : > { %v2250_v29 = vsel %vm2036_vm1, %v2245_v31, 0.0  ;;  %v3067_v41 = vpop.f32.mrf.mxu1  ;;  %v1443_v63 = vpop.f32.mrf.mxu0  ;;  %v1603_v31 = vadd.f32 %v3061_v15, %v1426_v9 }
 0x1c2   : > { %1774 = vadd.xlane.f32.xlu1 %v1773_v10  ;;  %2252 = vst [vmem:[#allocation3] sm:$0x1] %v2250_v29  ;;  %v1585_v10 = vadd.f32 %v1584_v8, %v1408_v56  ;;  %v1627_v11 = vadd.f32 %v3067_v41, %v1450_v50  ;;  %v1444_v60 = vadd.f32 %v1443_v63, %v4136_v4  ;;  %v1956_v9 = vmul.f32 2.0, %v1609_v44 }
 0x1c3   : > { %v1620_v43 = vpop.f32.mrf.mxu1  ;;  %v3014_v28 = vpop.f32.mrf.mxu0 }
 0x1c4   : > { %1771 = vadd.xlane.f32.xlu0 %v1770_v18  ;;  %v1952_v23 = vmul.f32 2.0, %v1585_v10  ;;  %v1462_v57 = vadd.f32 %v3014_v28, %v4141_v24  ;;  %v1621_v41 = vadd.f32 %v1620_v43, %v1444_v60  ;;  %v1959_v10 = vmul.f32 2.0, %v1627_v11 }
 0x1c5   : > { %v3070_v29 = vpop.f32.mrf.mxu1  ;;  %v1455_v37 = vpop.f32.mrf.mxu0 }
 0x1c6   : > { %1780 = vadd.xlane.f32.xlu1 %v1779_v32  ;;  %v1456_v24 = vadd.f32 %v1455_v37, %v4145_v33 }
 0x1c7   : > { %v1632_v35 = vpop.f32.mrf.mxu1 }
 0x1c8   : > { %1777 = vadd.xlane.f32.xlu0 %v1776_v13  ;;  %v1955_v13 = vmul.f32 2.0, %v1603_v31 }
 0x1c9   : > { %v2355_v7 = vld [vmem:[#allocation3] sm:$0x1]  ;;  %v3073_v15 = vpop.f32.mrf.mxu1 }
 0x1ca   : > { %1786 = vadd.xlane.f32.xlu1 %v1785_v48  ;;  %v2357_v34 = vsel %vm2356_vm2, %v2355_v7, 0.0 }
 0x1cb   : > { %v1644_v4 = vpop.f32.mrf.mxu1 }
 0x1cc   : > { %1783 = vadd.xlane.f32.xlu0 %v1782_v30 }
 0x1ce   : > { %1792 = vadd.xlane.f32.xlu1 %v1791_v3  ;;  %v3017_v3 = vpop.f32.mrf.mxu0 }
 0x1d0   : > { %1789 = vadd.xlane.f32.xlu0 %v1788_v0  ;;  %v1467_v5 = vpop.f32.mrf.mxu0 }
 0x1d2   : > { %2358 = vadd.xlane.f32.xlu1 %v2357_v34  ;;  %v3020_v43 = vpop.f32.mrf.mxu0 }
 0x1d3   : > { %v1486_v50 = vadd.f32 %v3020_v43, %v4155_v16 }
 0x23b   : > { %v2074_v49 = vpop.xlane.xlu1 %2073 }
 0x23c   : > { %2109 = vst.msk [vmem:[#allocation2 + $0x8] sm:$0xff] %vm2107_vm0, %v2074_v49 }
 0x23d   : > { %v2072_v6 = vpop.xlane.xlu0 %2071 }
 0x23e   : > { %2108 = vst.msk [vmem:[#allocation2] sm:$0xff] %vm2107_vm0, %v2072_v6 }
 0x23f   : > { %v1757_v1 = vpop.xlane.xlu1 %1756 }
 0x240   : > { %v1937_v18 = vadd.f32 %v4185_v62, %v1757_v1  ;;  %v1639_v1 = vadd.f32 %v3070_v29, %v1462_v57 }
 0x241   : > { %v1754_v54 = vpop.xlane.xlu0 %1753 }
 0x242   : > { %v1969_v32 = vsub.f32 %v1937_v18, %v1953_v45  ;;  %v1936_v27 = vadd.f32 %v4185_v62, %v1754_v54  ;;  %v1474_v18 = vadd.f32 %v3017_v3, %v4148_v21  ;;  %v1633_v54 = vadd.f32 %v1632_v35, %v1456_v24  ;;  %v1479_v35 = vpop.f32.mrf.mxu0 }
 0x243   : > { %v1763_v20 = vpop.xlane.xlu1 %1762  ;;  %v2266_v38 = vld [vmem:[#allocation2 + $0x8] sm:$0xff]  ;;  %v1961_v33 = vmul.f32 2.0, %v1639_v1  ;;  %v1468_v21 = vadd.f32 %v1467_v5, %v4152_v42  ;;  %v1480_v16 = vadd.f32 %v1479_v35, %v4158_v25 }
 0x244   : > { %v1939_v19 = vadd.f32 %v4185_v62, %v1763_v20  ;;  %v1985_v48 = vmax.f32 %v1969_v32, 0.0  ;;  %v1968_v30 = vsub.f32 %v1936_v27, %v1952_v23  ;;  %v2299_v58 = vsel %vm2107_vm0, %v2266_v38, 0.0  ;;  %v3076_v20 = vpop.f32.mrf.mxu1 }
 0x245   : > { %v1760_v7 = vpop.xlane.xlu0 %1759  ;;  %v2265_v39 = vld [vmem:[#allocation2] sm:$0xff]  ;;  %v1958_v32 = vmul.f32 2.0, %v1621_v41  ;;  %v1651_v37 = vadd.f32 %v3073_v15, %v1474_v18  ;;  %v1960_v3 = vmul.f32 2.0, %v1633_v54 }
 0x246   : > { %v1971_v0 = vsub.f32 %v1939_v19, %v1955_v13  ;;  %v2058_v34 = vsel %vm2036_vm1, %v1985_v48, inf  ;;  %v1938_v61 = vadd.f32 %v4185_v62, %v1760_v7  ;;  %v2298_v22 = vsel %vm2107_vm0, %v2265_v39, 0.0  ;;  %v1656_v44 = vpop.f32.mrf.mxu1 }
 0x247   : > { %v1769_v8 = vpop.xlane.xlu1 %1768  ;;  %2077 = vmin.xlane.f32.xlu1 %v2058_v34  ;;  %v2300_v59 = vadd.f32 %v2299_v58, %v2298_v22  ;;  %v1984_v26 = vmax.f32 %v1968_v30, 0.0  ;;  %v1963_v42 = vmul.f32 2.0, %v1651_v37  ;;  %v1663_v39 = vadd.f32 %v3076_v20, %v1486_v50 }
 0x248   : > { %v1941_v14 = vadd.f32 %v4185_v62, %v1769_v8  ;;  %v1987_v53 = vmax.f32 %v1971_v0, 0.0  ;;  %v1970_v17 = vsub.f32 %v1938_v61, %v1954_v55  ;;  %v1645_v0 = vadd.f32 %v1644_v4, %v1468_v21 }
 0x249   : > { %2329 = vadd.xlane.f32.xlu0 %v2300_v59  ;;  %v1766_v36 = vpop.xlane.xlu0 %1765  ;;  %v2057_v45 = vsel %vm2036_vm1, %v1984_v26, inf  ;;  %v1657_v60 = vadd.f32 %v1656_v44, %v1480_v16  ;;  %v1965_v57 = vmul.f32 2.0, %v1663_v39 }
 0x24a   : > { %v1973_v49 = vsub.f32 %v1941_v14, %v1957_v2  ;;  %v2060_v56 = vsel %vm2036_vm1, %v1987_v53, inf  ;;  %v1940_v6 = vadd.f32 %v4185_v62, %v1766_v36  ;;  %v1986_v31 = vmax.f32 %v1970_v17, 0.0 }
 0x24b   : > { %v1775_v47 = vpop.xlane.xlu1 %1774  ;;  %2081 = vmin.xlane.f32.xlu1 %v2060_v56  ;;  %v1962_v53 = vmul.f32 2.0, %v1645_v0 }
 0x24c   : > { %v1943_v63 = vadd.f32 %v4185_v62, %v1775_v47  ;;  %v1989_v51 = vmax.f32 %v1973_v49, 0.0  ;;  %v1972_v28 = vsub.f32 %v1940_v6, %v1956_v9  ;;  %v2059_v38 = vsel %vm2036_vm1, %v1986_v31, inf }
 0x24d   : > { %2075 = vmin.xlane.f32.xlu0 %v2057_v45  ;;  %v1772_v40 = vpop.xlane.xlu0 %1771  ;;  %v1964_v47 = vmul.f32 2.0, %v1657_v60 }
 0x24e   : > { %v1975_v12 = vsub.f32 %v1943_v63, %v1959_v10  ;;  %v2062_v29 = vsel %vm2036_vm1, %v1989_v51, inf  ;;  %v1942_v23 = vadd.f32 %v4185_v62, %v1772_v40  ;;  %v1988_v46 = vmax.f32 %v1972_v28, 0.0 }
 0x24f   : > { %v1781_v27 = vpop.xlane.xlu1 %1780  ;;  %2085 = vmin.xlane.f32.xlu1 %v2062_v29 }
 0x250   : > { %v1945_v13 = vadd.f32 %v4185_v62, %v1781_v27  ;;  %v1991_v19 = vmax.f32 %v1975_v12, 0.0  ;;  %v1974_v48 = vsub.f32 %v1942_v23, %v1958_v32  ;;  %v2061_v58 = vsel %vm2036_vm1, %v1988_v46, inf }
 0x251   : > { %2079 = vmin.xlane.f32.xlu0 %v2059_v38  ;;  %v1778_v55 = vpop.xlane.xlu0 %1777 }
 0x252   : > { %v1977_v30 = vsub.f32 %v1945_v13, %v1961_v33  ;;  %v2064_v2 = vsel %vm2036_vm1, %v1991_v19, inf  ;;  %v1944_v7 = vadd.f32 %v4185_v62, %v1778_v55  ;;  %v1990_v11 = vmax.f32 %v1974_v48, 0.0 }
 0x253   : > { %v1787_v34 = vpop.xlane.xlu1 %1786  ;;  %2089 = vmin.xlane.f32.xlu1 %v2064_v2 }
 0x254   : > { %v1947_v61 = vadd.f32 %v4185_v62, %v1787_v34  ;;  %v1993_v8 = vmax.f32 %v1977_v30, 0.0  ;;  %v1976_v22 = vsub.f32 %v1944_v7, %v1960_v3  ;;  %v2063_v36 = vsel %vm2036_vm1, %v1990_v11, inf }
 0x255   : > { %2083 = vmin.xlane.f32.xlu0 %v2061_v58  ;;  %v1784_v14 = vpop.xlane.xlu0 %1783 }
 0x256   : > { %v1979_v15 = vsub.f32 %v1947_v61, %v1963_v42  ;;  %v2066_v59 = vsel %vm2036_vm1, %v1993_v8, inf  ;;  %v1946_v17 = vadd.f32 %v4185_v62, %v1784_v14  ;;  %v1992_v56 = vmax.f32 %v1976_v22, 0.0 }
 0x257   : > { %v1793_v26 = vpop.xlane.xlu1 %1792  ;;  %2093 = vmin.xlane.f32.xlu1 %v2066_v59 }
 0x258   : > { %v1949_v25 = vadd.f32 %v4185_v62, %v1793_v26  ;;  %v1995_v5 = vmax.f32 %v1979_v15, 0.0  ;;  %v1978_v49 = vsub.f32 %v1946_v17, %v1962_v53  ;;  %v2065_v63 = vsel %vm2036_vm1, %v1992_v56, inf }
 0x259   : > { %2087 = vmin.xlane.f32.xlu0 %v2063_v36  ;;  %v1790_v41 = vpop.xlane.xlu0 %1789 }
 0x25a   : > { %v1981_v9 = vsub.f32 %v1949_v25, %v1965_v57  ;;  %v2068_v6 = vsel %vm2036_vm1, %v1995_v5, inf  ;;  %v1948_v10 = vadd.f32 %v4185_v62, %v1790_v41  ;;  %v1994_v51 = vmax.f32 %v1978_v49, 0.0 }
 0x25b   : > { %2097 = vmin.xlane.f32.xlu1 %v2068_v6  ;;  %v2359_v31 = vpop.xlane.xlu1 %2358 }
 0x25c   : > { %v1997_v1 = vmax.f32 %v1981_v9, 0.0  ;;  %v1980_v4 = vsub.f32 %v1948_v10, %v1964_v47  ;;  %v2067_v28 = vsel %vm2036_vm1, %v1994_v51, inf  ;;  %v2360_v18 = vrot.slane %v2359_v31, 4 }
 0x25d   : > { %2091 = vmin.xlane.f32.xlu0 %v2065_v63 }
 0x25e   : > { %v2070_v24 = vsel %vm2036_vm1, %v1997_v1, inf  ;;  %v1996_v45 = vmax.f32 %v1980_v4, 0.0  ;;  %v2361_v43 = vadd.f32 %v2360_v18, %v2359_v31 }
 0x25f   : > { %2101 = vmin.xlane.f32.xlu1 %v2070_v24 }
 0x260   : > { %v2069_v62 = vsel %vm2036_vm1, %v1996_v45, inf  ;;  %v2362_v40 = vrot.slane %v2361_v43, 2 }
 0x261   : > { %2095 = vmin.xlane.f32.xlu0 %v2067_v28 }
 0x262   : > { %v2363_v33 = vadd.f32 %v2362_v40, %v2361_v43 }
 0x264   : > { %v2364_v21 = vrot.slane %v2363_v33, 1 }
 0x265   : > { %2099 = vmin.xlane.f32.xlu0 %v2069_v62 }
 0x266   : > { %v2365_v50 = vadd.f32 %v2364_v21, %v2363_v33 }
 0x2d0   : > { %v2078_v12 = vpop.xlane.xlu1 %2077 }
 0x2d2   : > { %v2330_v29 = vpop.xlane.xlu0 %2329 }
 0x2d3   : > { %v2331_v32 = vrot.slane %v2330_v29, 4 }
 0x2d4   : > { %v2082_v54 = vpop.xlane.xlu1 %2081 }
 0x2d5   : > { %v2332_v23 = vadd.f32 %v2331_v32, %v2330_v29 }
 0x2d6   : > { %v2076_v27 = vpop.xlane.xlu0 %2075 }
 0x2d7   : > { %v2333_v37 = vrot.slane %v2332_v23, 2 }
 0x2d8   : > { %v2086_v20 = vpop.xlane.xlu1 %2085 }
 0x2d9   : > { %v2334_v13 = vadd.f32 %v2333_v37, %v2332_v23 }
 0x2da   : > { %v2080_v19 = vpop.xlane.xlu0 %2079 }
 0x2db   : > { %v2335_v48 = vrot.slane %v2334_v13, 1 }
 0x2dc   : > { %v2090_v52 = vpop.xlane.xlu1 %2089 }
 0x2dd   : > { %v2336_v38 = vadd.f32 %v2335_v48, %v2334_v13 }
 0x2de   : > { %v2084_v46 = vpop.xlane.xlu0 %2083 }
 0x2df   : > { %3077 = vpush %v2336_v38 }
 0x2e0   : > { %v2094_v35 = vpop.xlane.xlu1 %2093  ;;  %3079 = vpush %v2365_v50 }
 0x2e2   : > { %v2088_v30 = vpop.xlane.xlu0 %2087 }
 0x2e4   : > { %v2098_v55 = vpop.xlane.xlu1 %2097 }
 0x2e6   : > { %v2092_v2 = vpop.xlane.xlu0 %2091 }
 0x2e8   : > { %v2102_v3 = vpop.xlane.xlu1 %2101 }
 0x2ea   : > { %v2096_v0 = vpop.xlane.xlu0 %2095 }
 0x2ee   : > { %v2100_v7 = vpop.xlane.xlu0 %2099 }
 0x310   : > { %s3078_s27 = spop %3077 }
 0x311   : > { %s2338_s28 = smul.f32 0.0625, %s3078_s27  ;;  %s3080_s29 = spop %3079 }
 0x312   : > { %s2367_s30 = smul.f32 0.0625, %s3080_s29  ;;  %s3161_s27 = scalar_lea.vmem %s3160_s19, 256 }
 0x313   : > { %v2342_v34 = vstv %s2338_s28  ;;  %p3163_p2 = scmp.lt.s32.totalorder %s3161_s27, %s3155_s8 }
 0x314   : > { %2343 = vst [vmem:[%s223_s23] sm:$0xff] %v2342_v34  ;;  %v2368_v42 = vstv %s2367_s30 }
 0x315   : > { %2369 = vst [vmem:[%s230_s10] sm:$0xff] %v2368_v42  ;;  %p3164_p3 = por %p3163_p2, %p3162_p1 }
 0x317   : > { %p3165_p5 = pnand %p3164_p3, %p3158_p0 }
 0x319   : > { %3168 = shalt.err (!%p3165_p5)
}
 0x31a   : > { %s3169_s9 = scalar_lea.hbm %s4292_s21, 128  ;;  %s3173_s28 = scalar_lea.hbm %s4369_s2, 256 }
 0x31b   : > { %p3170_p6 = scmp.ne.s32.totalorder %s4292_s21, %s3169_s9  ;;  %p3174_p10 = scmp.lt.s32.totalorder %s4292_s21, %s4369_s2 }
 0x31c   : > { %p3175_p11 = scmp.lt.s32.totalorder %s3173_s28, %s3169_s9 }
 0x31d   : > { %p3171_p7 = pnand %p3170_p6, %p3325_p4 }
 0x31e   : > { %p3176_p12 = por %p3175_p11, %p3174_p10 }
 0x31f   : > { %p3172_p9 = pneg %p3171_p7 }
 0x321   : > { %p3177_p13 = pnand %p3176_p12, %p3172_p9 }
 0x323   : > { %3180 = shalt.err (!%p3177_p13)
}
 0x324   : > { %3081 = dma.vmem_to_hbm [thread:$0]  (%p3325_p4), %s4294_s26, 128, %s4292_s21, %s2371_s6  }
 0x325   : > { %s2376_s15 = scalar_lea.sflag [#allocation7], %s4285_s7  ;;  %s3181_s4 = scalar_lea.vmem %s4301_s11, 128 }
 0x326   : > { %p3182_p0 = scmp.ne.s32.totalorder %s4301_s11, %s3181_s4  ;;  %s3264_s8 = smov [#allocation6]  }
 0x327   : > { %s3185_s18 = sshll.u32 %s3264_s8, 4  ;;  %s3186_s18 = int_to_ptr.vmem [resolvable:$false] %s3185_s18 }
 0x328   : > { %p3183_p1 = pnand %p3182_p0, %p3325_p4  ;;  %s3187_s19 = scalar_lea.vmem %s3186_s18, 256 }
 0x329   : > { %p3188_p3 = scmp.lt.s32.totalorder %s4301_s11, %s3186_s18  ;;  %p3189_p5 = scmp.lt.s32.totalorder %s3187_s19, %s3181_s4 }
 0x32a   : > { %p3184_p2 = pneg %p3183_p1 }
 0x32b   : > { %p3190_p6 = por %p3189_p5, %p3188_p3 }
 0x32d   : > { %p3191_p7 = pnand %p3190_p6, %p3184_p2 }
 0x32f   : > { %3194 = shalt.err (!%p3191_p7)
}
 0x330   : > { %s3195_s21 = scalar_lea.hbm %s4299_s5, 128  ;;  %s3199_s6 = scalar_lea.hbm %s4370_s3, 256 }
 0x331   : > { %p3196_p9 = scmp.ne.s32.totalorder %s4299_s5, %s3195_s21  ;;  %p3200_p12 = scmp.lt.s32.totalorder %s4299_s5, %s4370_s3 }
 0x332   : > { %p3201_p13 = scmp.lt.s32.totalorder %s3199_s6, %s3195_s21 }
 0x333   : > { %p3197_p10 = pnand %p3196_p9, %p3325_p4 }
 0x334   : > { %p3202_p0 = por %p3201_p13, %p3200_p12 }
 0x335   : > { %p3198_p11 = pneg %p3197_p10 }
 0x337   : > { %p3203_p1 = pnand %p3202_p0, %p3198_p11 }
 0x339   : > { %3206 = shalt.err (!%p3203_p1)
}
 0x33a   : > { %3082 = dma.vmem_to_hbm [thread:$0]  (%p3325_p4), %s4301_s11, 128, %s4299_s5, %s2376_s15  }
 0x33b PF: > { %p3092_p2 = scmp.ge.s32.totalorder %s3261_s17, 2  ;;  %s2414_s10 = sand.u32 1, %s3241_s12  }
 0x33c   : > { %s2415_s23 = scalar_lea.sflag [#allocation5], %s2414_s10 }
 0x33d   : > { %p3086_p3 = pnand %p3092_p2, %p3332_p8 }
 0x33f   : > { %p3087_p5 = pneg %p3086_p3 }
 0x341   : > { %3232 = dma.done.wait (%p3087_p5), %s2415_s23, 128  }
 0x342   : > { %3234 = vsyncadd (%p3087_p5), %s2415_s23, 4294967168  ;;  %s2424_s28 = scalar_lea.sflag [#allocation7], %s2414_s10 }
 0x343   : > { %3236 = dma.done.wait (%p3087_p5), %s2424_s28, 128  }
 0x344   : > { %3238 = vsyncadd (%p3087_p5), %s2424_s28, 4294967168  ;;  %s20_s17 = sadd.s32 1, %s3261_s17   ;;  %s4559_s12 = smov %s3245_s13 }
 0x345   : > { %p17_p6 = scmp.ge.s32.totalorder %s20_s17, 4   ;;  %s4560_s13 = smov %s3249_s14 }
 0x346   : > { %s4561_s14 = smov %s3338_s25  ;;  %s4562_s15 = smov %s3257_s16 }
 0x347   : > { %s4563_s16 = smov %s4565_s20  ;;  %19 = sbr.rel (!%p17_p6) target bundleno = 6 (0x6), region = 117 }
 0x34c   :  { %2429 = vsyncpa [#allocation5], 1 }
 0x34d   :  { %2431 = vsyncpa [#allocation5 + $0x1], 1 }
 0x34e   :  { %2432 = vsyncpa [#allocation7], 1 }
 0x34f   :  { %2434 = vsyncpa [#allocation7 + $0x1], 1 }

</bundles_post_ra>
